<compile_context>
chip_gen: v7x
topology: tpu7x:2x2x1
jax: 0.10.0
libtpu: 0.0.40
codegen_flags: <defaults>
</compile_context>

<pallas_src>
import functools
from itertools import product

import jax
import jax.numpy as jnp
from jax.experimental import pallas as pl
from jax.experimental.pallas import tpu as pltpu


def _round_up(x, m):
    return ((x + m - 1) // m) * m


def _kernel_offsets(ks, dilation, D):
    r = ks // 2
    rng = [d * dilation for d in range(-r, r + 1)]
    return list(product(*([rng] * D)))        # K = ks**D offsets


# ----------------------------- Pallas kernels --------------------------------


def _matmul_stats_kernel(g_ref, w_ref, conv_ref, psum_ref, psumsq_ref):
    """Pass 1: sparse-conv-as-matmul (MXU) + BN batch-statistic accumulation.

    g_ref      : [TILE_N, K_pad]  bf16 im2col tile (padded rows/cols are zero)
    w_ref      : [K_pad, C_pad]   bf16 flattened kernel weights (zero padded)
    conv_ref   : [TILE_N, C_pad]  f32  conv output tile (lane-dense)
    psum_ref   : [1, C_pad]       f32  running per-channel sum      (resident accumulator)
    psumsq_ref : [1, C_pad]       f32  running per-channel sum(x^2) (resident accumulator)

    Zero-padded rows of g produce zero conv rows -> they contribute 0 to the stats.
    """
    conv = jnp.dot(g_ref[...], w_ref[...], preferred_element_type=jnp.float32)
    conv_ref[...] = conv

    @pl.when(pl.program_id(0) == 0)
    def _():
        psum_ref[...] = jnp.zeros_like(psum_ref)
        psumsq_ref[...] = jnp.zeros_like(psumsq_ref)

    psum_ref[...] += jnp.sum(conv, axis=0, keepdims=True)
    psumsq_ref[...] += jnp.sum(conv * conv, axis=0, keepdims=True)


def _bn_relu_kernel(conv_ref, scale_ref, shift_ref, o_ref):
    """Pass 2: folded BatchNorm (y = x*scale + shift) + ReLU."""
    o_ref[...] = jnp.maximum(conv_ref[...] * scale_ref[...] + shift_ref[...], 0.0)


def _bn_add_relu_kernel(conv_ref, skip_ref, scale_ref, shift_ref,
                        sscale_ref, sshift_ref, o_ref):
    """Final fusion: relu( BN2(conv2) + BN_ds(skip) ).

    Identity skip is expressed with sscale = 1, sshift = 0 and skip = raw input.
    """
    y = (conv_ref[...] * scale_ref[...] + shift_ref[...]
         + skip_ref[...] * sscale_ref[...] + sshift_ref[...])
    o_ref[...] = jnp.maximum(y, 0.0)


# ------------------------------ pallas_call wrappers --------------------------


_VMEM_LIMIT = 32 * 1024 * 1024   # safe on v5e/v6e/v7x; kernel uses far less


def _matmul_stats(g, w, tile_n):
    n_pad, k_pad = g.shape
    _, c_pad = w.shape
    n_tiles = n_pad // tile_n
    cost = pl.CostEstimate(
        flops=2 * n_pad * k_pad * c_pad,
        transcendentals=0,
        bytes_accessed=(g.size * g.dtype.itemsize + w.size * w.dtype.itemsize
                        + (n_pad + 2) * c_pad * 4))
    return pl.pallas_call(
        _matmul_stats_kernel,
        out_shape=(jax.ShapeDtypeStruct((n_pad, c_pad), jnp.float32),
                   jax.ShapeDtypeStruct((1, c_pad), jnp.float32),
                   jax.ShapeDtypeStruct((1, c_pad), jnp.float32)),
        grid=(n_tiles,),
        in_specs=[pl.BlockSpec((tile_n, k_pad), lambda i: (i, 0)),
                  pl.BlockSpec((k_pad, c_pad), lambda i: (0, 0))],
        out_specs=(pl.BlockSpec((tile_n, c_pad), lambda i: (i, 0)),
                   pl.BlockSpec((1, c_pad), lambda i: (0, 0)),
                   pl.BlockSpec((1, c_pad), lambda i: (0, 0))),
        compiler_params=pltpu.CompilerParams(
            # Stats accumulate across the row-tile axis -> "arbitrary".
            # TODO(synk): for v7x 2-TC sharding, emit per-core partial stats and mark
            #             this axis "parallel", combining partials in the wrapper.
            dimension_semantics=("arbitrary",),
            vmem_limit_bytes=_VMEM_LIMIT),
        cost_estimate=cost,
    )(g, w)


def _bn_relu(conv, scale, shift, tile_n):
    n_pad, c_pad = conv.shape
    n_tiles = n_pad // tile_n
    row = pl.BlockSpec((tile_n, c_pad), lambda i: (i, 0))
    vec = pl.BlockSpec((1, c_pad), lambda i: (0, 0))
    return pl.pallas_call(
        _bn_relu_kernel,
        out_shape=jax.ShapeDtypeStruct((n_pad, c_pad), jnp.float32),
        grid=(n_tiles,),
        in_specs=[row, vec, vec],
        out_specs=row,
        compiler_params=pltpu.CompilerParams(dimension_semantics=("parallel",),
                                             vmem_limit_bytes=_VMEM_LIMIT),
    )(conv, scale, shift)


def _bn_add_relu(conv, skip, scale, shift, sscale, sshift, tile_n):
    n_pad, c_pad = conv.shape
    n_tiles = n_pad // tile_n
    row = pl.BlockSpec((tile_n, c_pad), lambda i: (i, 0))
    vec = pl.BlockSpec((1, c_pad), lambda i: (0, 0))
    return pl.pallas_call(
        _bn_add_relu_kernel,
        out_shape=jax.ShapeDtypeStruct((n_pad, c_pad), jnp.float32),
        grid=(n_tiles,),
        in_specs=[row, row, vec, vec, vec, vec],
        out_specs=row,
        compiler_params=pltpu.CompilerParams(dimension_semantics=("parallel",),
                                             vmem_limit_bytes=_VMEM_LIMIT),
    )(conv, skip, scale, shift, sscale, sshift)


def _bn_fold(psum, psumsq, gamma_pad, beta_pad, n_valid, eps=1e-5):
    """Training-mode BatchNorm1d folded into (scale, shift) on [1, C_pad] vectors."""
    mean = psum / n_valid
    var = jnp.maximum(psumsq / n_valid - mean * mean, 0.0)   # biased batch variance
    scale = gamma_pad * jax.lax.rsqrt(var + eps)
    shift = beta_pad - mean * scale
    return scale, shift


# --------------------------------- forward ------------------------------------


def residual_block(coords, feats, params, *, batch_size, spatial_shape,
                   ks=3, stride=1, dilation=1, tile_n=256, eps=1e-5):
    """ResidualBlock forward on a MinkowskiEngine-style sparse tensor (stride=1).

    coords : [N, 4] int32 (batch, x, y, z);  feats : [N, inc]
    params : w1 [K, inc, outc], gamma1/beta1 [outc]   (conv1 + BN1)
             w2 [K, outc, outc], gamma2/beta2 [outc]  (conv2 + BN2)
             and, iff inc != outc: w_ds [inc, outc], gamma_ds/beta_ds [outc]
    Returns [N, outc] float32 features at the input coordinates.
    """
    # TODO(synk): stride > 1 changes the output coordinate set (ME coordinate-map
    #             downsampling) -- index plumbing only, not implemented.
    assert stride == 1, "only stride=1 implemented"
    N, inc = feats.shape
    K, _, outc = params["w1"].shape
    offsets = _kernel_offsets(ks, dilation, 3)
    assert len(offsets) == K
    pad = (ks // 2) * dilation
    X, Y, Z = spatial_shape

    # ---- glue: neighbor-index table via dense lookup grid ---------------------
    # TODO(synk): replace the O(volume) dense lookup with a hash/sorted-coordinate
    #             lookup, and move the im2col gather in-kernel (scalar-prefetched
    #             indices + VMEM-resident feats) to avoid the K-times HBM copy.
    lookup = jnp.full((batch_size, X + 2 * pad, Y + 2 * pad, Z + 2 * pad),
                      N, dtype=jnp.int32)                      # N == "missing" sentinel
    lookup = lookup.at[coords[:, 0],
                       coords[:, 1] + pad,
                       coords[:, 2] + pad,
                       coords[:, 3] + pad].set(jnp.arange(N, dtype=jnp.int32))
    nbr_idx = jnp.stack(
        [lookup[coords[:, 0], coords[:, 1] + pad + dx,
                coords[:, 2] + pad + dy, coords[:, 3] + pad + dz]
         for (dx, dy, dz) in offsets], axis=1)                 # [N, K]

    n_valid = float(max(N, 1))
    n_pad = _round_up(max(N, 1), tile_n)
    c_pad = _round_up(outc, 128)          # lane-dense outputs (unmasked stores)

    def im2col(f, c):
        """[N, c] f32 -> [n_pad, round_up(K*c, 128)] bf16 im2col matrix."""
        f_ext = jnp.concatenate([f, jnp.zeros((1, c), jnp.float32)], axis=0)
        g = f_ext[nbr_idx].reshape(N, K * c)
        k_pad = _round_up(K * c, 128)     # 128-aligned contraction dim
        g = jnp.pad(g, ((0, n_pad - N), (0, k_pad - K * c)))
        return g.astype(jnp.bfloat16)

    def pad_w(w_kcc):
        Kk, ci, co = w_kcc.shape
        w = w_kcc.astype(jnp.float32).reshape(Kk * ci, co)
        w = jnp.pad(w, ((0, _round_up(Kk * ci, 128) - Kk * ci), (0, c_pad - co)))
        return w.astype(jnp.bfloat16)

    def pad_vec(v):
        return jnp.pad(v.astype(jnp.float32), (0, c_pad - v.shape[0])).reshape(1, c_pad)

    feats32 = feats.astype(jnp.float32)

    # ---- main branch: conv1 -> BN1 -> ReLU ------------------------------------
    conv1, s1, q1 = _matmul_stats(im2col(feats32, inc), pad_w(params["w1"]), tile_n)
    sc1, sh1 = _bn_fold(s1, q1, pad_vec(params["gamma1"]), pad_vec(params["beta1"]),
                        n_valid, eps)
    h1 = _bn_relu(conv1, sc1, sh1, tile_n)                     # [n_pad, c_pad]

    # ---- conv2 -> BN2 ----------------------------------------------------------
    conv2, s2, q2 = _matmul_stats(im2col(h1[:N, :outc], outc), pad_w(params["w2"]),
                                  tile_n)
    sc2, sh2 = _bn_fold(s2, q2, pad_vec(params["gamma2"]), pad_vec(params["beta2"]),
                        n_valid, eps)

    # ---- skip path -------------------------------------------------------------
    if "w_ds" in params:                  # 1x1x1 conv + BN (inc != outc case)
        ci_pad = _round_up(inc, 128)
        x_ds = jnp.pad(feats32, ((0, n_pad - N), (0, ci_pad - inc))).astype(jnp.bfloat16)
        w_ds = jnp.pad(params["w_ds"].astype(jnp.float32),
                       ((0, ci_pad - inc), (0, c_pad - outc))).astype(jnp.bfloat16)
        skip, sd, qd = _matmul_stats(x_ds, w_ds, tile_n)
        scd, shd = _bn_fold(sd, qd, pad_vec(params["gamma_ds"]),
                            pad_vec(params["beta_ds"]), n_valid, eps)
    else:                                 # identity skip
        skip = jnp.pad(feats32, ((0, n_pad - N), (0, c_pad - inc)))
        scd = jnp.ones((1, c_pad), jnp.float32)
        shd = jnp.zeros((1, c_pad), jnp.float32)

    # ---- final fusion: relu( BN2(conv2) + BN_ds(skip) ) -------------------------
    out = _bn_add_relu(conv2, skip, sc2, sh2, scd, shd, tile_n)
    return out[:N, :outc]


# ----------------------------------- demo --------------------------------------

if __name__ == "__main__":
    key = jax.random.PRNGKey(0)
    k_coords, k_feats, k_w1, k_w2, k_wds = jax.random.split(key, 5)

    # module config: inc=4, outc=8, ks=3, stride=1, dilation=1, D=3
    INC, OUTC, KS = 4, 8, 3
    B, S = 2, 16                     # batch=2, 16^3 voxel grid
    PTS = 200                        # occupied voxels per batch item
    K = KS ** 3

    # unique occupied voxel coordinates per batch element
    coord_list = []
    perm_keys = jax.random.split(k_coords, B)
    for b in range(B):
        flat = jax.random.permutation(perm_keys[b], S * S * S)[:PTS]
        xs, ys, zs = flat // (S * S), (flat // S) % S, flat % S
        bcol = jnp.full((PTS,), b, dtype=jnp.int32)
        coord_list.append(jnp.stack(
            [bcol, xs.astype(jnp.int32), ys.astype(jnp.int32), zs.astype(jnp.int32)],
            axis=1))
    coords = jnp.concatenate(coord_list, axis=0)               # [400, 4]
    N = coords.shape[0]
    feats = jax.random.normal(k_feats, (N, INC), dtype=jnp.float32)

    params = {
        "w1": 0.1 * jax.random.normal(k_w1, (K, INC, OUTC), jnp.float32),
        "gamma1": jnp.ones((OUTC,), jnp.float32),
        "beta1": jnp.zeros((OUTC,), jnp.float32),
        "w2": 0.1 * jax.random.normal(k_w2, (K, OUTC, OUTC), jnp.float32),
        "gamma2": jnp.ones((OUTC,), jnp.float32),
        "beta2": jnp.zeros((OUTC,), jnp.float32),
        # inc != outc -> downsample branch is a 1x1x1 conv + BN (as in the module)
        "w_ds": 0.1 * jax.random.normal(k_wds, (INC, OUTC), jnp.float32),
        "gamma_ds": jnp.ones((OUTC,), jnp.float32),
        "beta_ds": jnp.zeros((OUTC,), jnp.float32),
    }

    fwd = jax.jit(functools.partial(
        residual_block, batch_size=B, spatial_shape=(S, S, S),
        ks=KS, stride=1, dilation=1, tile_n=256))

    out = fwd(coords, feats, params)
    jax.block_until_ready(out)

    assert out.shape == (N, OUTC) and out.dtype == jnp.float32
    assert bool(jnp.isfinite(out).all())
    assert bool((out >= 0.0).all())          # final ReLU
    print("KERNEL_OK")
</pallas_src>

<mosaic_0001>
module attributes {stable_mosaic.version = 11 : i64} {
  func.func @_matmul_stats_kernel(%arg0: i32, %arg1: memref<256x128xbf16, #tpu.memory_space<vmem>>, %arg2: memref<128x128xbf16, #tpu.memory_space<vmem>>, %arg3: memref<256x128xf32, #tpu.memory_space<vmem>>, %arg4: memref<1x128xf32, #tpu.memory_space<vmem>>, %arg5: memref<1x128xf32, #tpu.memory_space<vmem>>) attributes {dimension_semantics = [#tpu.dimension_semantics<arbitrary>], iteration_bounds = array<i64: 2>, scalar_prefetch = 0 : i64, scratch_operands = 0 : i64, tpu.core_type = #tpu.core_type<tc>, window_params = [{transform_indices = @transform_0, window_bounds = array<i64: 256, 128>}, {pipeline_mode = #tpu.pipeline_mode<synchronous>, transform_indices = @transform_1, window_bounds = array<i64: 128, 128>}, {transform_indices = @transform_2, window_bounds = array<i64: 256, 128>}, {pipeline_mode = #tpu.pipeline_mode<synchronous>, transform_indices = @transform_3, window_bounds = array<i64: 1, 128>}, {pipeline_mode = #tpu.pipeline_mode<synchronous>, transform_indices = @transform_4, window_bounds = array<i64: 1, 128>}]} {
    %c0 = arith.constant 0 : index
    %c0_0 = arith.constant 0 : index
    %0 = vector.load %arg1[%c0, %c0_0] : memref<256x128xbf16, #tpu.memory_space<vmem>>, vector<256x128xbf16>
    %c0_1 = arith.constant 0 : index
    %c0_2 = arith.constant 0 : index
    %1 = vector.load %arg2[%c0_1, %c0_2] : memref<128x128xbf16, #tpu.memory_space<vmem>>, vector<128x128xbf16>
    %cst = arith.constant dense<0.000000e+00> : vector<256x128xf32>
    %2 = tpu.matmul %0, %1, %cst {dimension_numbers = #tpu.dot_dimension_numbers<[1], [0], [0], [1], [0, 0, 1, 1], [], []>} : vector<256x128xbf16>, vector<128x128xbf16>, vector<256x128xf32> -> vector<256x128xf32>
    %c0_3 = arith.constant 0 : index
    %c0_4 = arith.constant 0 : index
    %3 = vector.load %arg3[%c0_3, %c0_4] : memref<256x128xf32, #tpu.memory_space<vmem>>, vector<256x128xf32>
    tpu.vector_store %arg3[%c0_3, %c0_4], %2 {strides = array<i32>} : memref<256x128xf32, #tpu.memory_space<vmem>>, vector<256x128xf32>,
    %c0_i32 = arith.constant 0 : i32
    %4 = arith.cmpi eq, %arg0, %c0_i32 : i32
    %5 = arith.extui %4 : i1 to i32
    %c0_i32_5 = arith.constant 0 : i32
    %6 = arith.cmpi ne, %5, %c0_i32_5 : i32
    scf.if %6 {
      %cst_16 = arith.constant 0.000000e+00 : f32
      %18 = vector.broadcast %cst_16 : f32 to vector<1x128xf32>
      %c0_17 = arith.constant 0 : index
      %c0_18 = arith.constant 0 : index
      %19 = vector.load %arg4[%c0_17, %c0_18] : memref<1x128xf32, #tpu.memory_space<vmem>>, vector<1x128xf32>
      tpu.vector_store %arg4[%c0_17, %c0_18], %18 {strides = array<i32>} : memref<1x128xf32, #tpu.memory_space<vmem>>, vector<1x128xf32>,
      %cst_19 = arith.constant 0.000000e+00 : f32
      %20 = vector.broadcast %cst_19 : f32 to vector<1x128xf32>
      %c0_20 = arith.constant 0 : index
      %c0_21 = arith.constant 0 : index
      %21 = vector.load %arg5[%c0_20, %c0_21] : memref<1x128xf32, #tpu.memory_space<vmem>>, vector<1x128xf32>
      tpu.vector_store %arg5[%c0_20, %c0_21], %20 {strides = array<i32>} : memref<1x128xf32, #tpu.memory_space<vmem>>, vector<1x128xf32>,
    } else {
    }
    %c0_6 = arith.constant 0 : index
    %c0_7 = arith.constant 0 : index
    %7 = vector.load %arg4[%c0_6, %c0_7] : memref<1x128xf32, #tpu.memory_space<vmem>>, vector<1x128xf32>
    %cst_8 = arith.constant dense<0.000000e+00> : vector<128xf32>
    %8 = vector.multi_reduction <add>, %2, %cst_8 [0] : vector<256x128xf32> to vector<128xf32>
    %9 = vector.shape_cast %8 : vector<128xf32> to vector<1x128xf32>
    %10 = arith.addf %7, %9 : vector<1x128xf32>
    %c0_9 = arith.constant 0 : index
    %c0_10 = arith.constant 0 : index
    %11 = vector.load %arg4[%c0_9, %c0_10] : memref<1x128xf32, #tpu.memory_space<vmem>>, vector<1x128xf32>
    tpu.vector_store %arg4[%c0_9, %c0_10], %10 {strides = array<i32>} : memref<1x128xf32, #tpu.memory_space<vmem>>, vector<1x128xf32>,
    %c0_11 = arith.constant 0 : index
    %c0_12 = arith.constant 0 : index
    %12 = vector.load %arg5[%c0_11, %c0_12] : memref<1x128xf32, #tpu.memory_space<vmem>>, vector<1x128xf32>
    %13 = arith.mulf %2, %2 : vector<256x128xf32>
    %cst_13 = arith.constant dense<0.000000e+00> : vector<128xf32>
    %14 = vector.multi_reduction <add>, %13, %cst_13 [0] : vector<256x128xf32> to vector<128xf32>
    %15 = vector.shape_cast %14 : vector<128xf32> to vector<1x128xf32>
    %16 = arith.addf %12, %15 : vector<1x128xf32>
    %c0_14 = arith.constant 0 : index
    %c0_15 = arith.constant 0 : index
    %17 = vector.load %arg5[%c0_14, %c0_15] : memref<1x128xf32, #tpu.memory_space<vmem>>, vector<1x128xf32>
    tpu.vector_store %arg5[%c0_14, %c0_15], %16 {strides = array<i32>} : memref<1x128xf32, #tpu.memory_space<vmem>>, vector<1x128xf32>,
    return
  }
  func.func @transform_0(%arg0: i32) -> (i32, i32) {
    %c0_i32 = arith.constant 0 : i32
    %c0_i32_0 = arith.constant 0 : i32
    return %arg0, %c0_i32 : i32, i32
  }
  func.func @transform_1(%arg0: i32) -> (i32, i32) {
    %c0_i32 = arith.constant 0 : i32
    %c0_i32_0 = arith.constant 0 : i32
    %c0_i32_1 = arith.constant 0 : i32
    return %c0_i32, %c0_i32_0 : i32, i32
  }
  func.func @transform_2(%arg0: i32) -> (i32, i32) {
    %c0_i32 = arith.constant 0 : i32
    %c0_i32_0 = arith.constant 0 : i32
    return %arg0, %c0_i32 : i32, i32
  }
  func.func @transform_3(%arg0: i32) -> (i32, i32) {
    %c0_i32 = arith.constant 0 : i32
    %c0_i32_0 = arith.constant 0 : i32
    %c0_i32_1 = arith.constant 0 : i32
    return %c0_i32, %c0_i32_0 : i32, i32
  }
  func.func @transform_4(%arg0: i32) -> (i32, i32) {
    %c0_i32 = arith.constant 0 : i32
    %c0_i32_0 = arith.constant 0 : i32
    %c0_i32_1 = arith.constant 0 : i32
    return %c0_i32, %c0_i32_0 : i32, i32
  }
}

module attributes {stable_mosaic.version = 11 : i64} {
  func.func @_bn_relu_kernel(%arg0: i32, %arg1: memref<256x128xf32, #tpu.memory_space<vmem>>, %arg2: memref<1x128xf32, #tpu.memory_space<vmem>>, %arg3: memref<1x128xf32, #tpu.memory_space<vmem>>, %arg4: memref<256x128xf32, #tpu.memory_space<vmem>>) attributes {dimension_semantics = [#tpu.dimension_semantics<parallel>], iteration_bounds = array<i64: 2>, scalar_prefetch = 0 : i64, scratch_operands = 0 : i64, tpu.core_type = #tpu.core_type<tc>, window_params = [{transform_indices = @transform_0, window_bounds = array<i64: 256, 128>}, {pipeline_mode = #tpu.pipeline_mode<synchronous>, transform_indices = @transform_1, window_bounds = array<i64: 1, 128>}, {pipeline_mode = #tpu.pipeline_mode<synchronous>, transform_indices = @transform_2, window_bounds = array<i64: 1, 128>}, {transform_indices = @transform_3, window_bounds = array<i64: 256, 128>}]} {
    %c0 = arith.constant 0 : index
    %c0_0 = arith.constant 0 : index
    %0 = vector.load %arg1[%c0, %c0_0] : memref<256x128xf32, #tpu.memory_space<vmem>>, vector<256x128xf32>
    %c0_1 = arith.constant 0 : index
    %c0_2 = arith.constant 0 : index
    %1 = vector.load %arg2[%c0_1, %c0_2] : memref<1x128xf32, #tpu.memory_space<vmem>>, vector<1x128xf32>
    %2 = vector.broadcast %1 : vector<1x128xf32> to vector<256x128xf32>
    %3 = arith.mulf %0, %2 : vector<256x128xf32>
    %c0_3 = arith.constant 0 : index
    %c0_4 = arith.constant 0 : index
    %4 = vector.load %arg3[%c0_3, %c0_4] : memref<1x128xf32, #tpu.memory_space<vmem>>, vector<1x128xf32>
    %5 = vector.broadcast %4 : vector<1x128xf32> to vector<256x128xf32>
    %6 = arith.addf %3, %5 : vector<256x128xf32>
    %cst = arith.constant 0.000000e+00 : f32
    %7 = vector.broadcast %cst : f32 to vector<256x128xf32>
    %8 = arith.maximumf %6, %7 : vector<256x128xf32>
    %c0_5 = arith.constant 0 : index
    %c0_6 = arith.constant 0 : index
    %9 = vector.load %arg4[%c0_5, %c0_6] : memref<256x128xf32, #tpu.memory_space<vmem>>, vector<256x128xf32>
    tpu.vector_store %arg4[%c0_5, %c0_6], %8 {strides = array<i32>} : memref<256x128xf32, #tpu.memory_space<vmem>>, vector<256x128xf32>,
    return
  }
  func.func @transform_0(%arg0: i32) -> (i32, i32) {
    %c0_i32 = arith.constant 0 : i32
    %c0_i32_0 = arith.constant 0 : i32
    return %arg0, %c0_i32 : i32, i32
  }
  func.func @transform_1(%arg0: i32) -> (i32, i32) {
    %c0_i32 = arith.constant 0 : i32
    %c0_i32_0 = arith.constant 0 : i32
    %c0_i32_1 = arith.constant 0 : i32
    return %c0_i32, %c0_i32_0 : i32, i32
  }
  func.func @transform_2(%arg0: i32) -> (i32, i32) {
    %c0_i32 = arith.constant 0 : i32
    %c0_i32_0 = arith.constant 0 : i32
    %c0_i32_1 = arith.constant 0 : i32
    return %c0_i32, %c0_i32_0 : i32, i32
  }
  func.func @transform_3(%arg0: i32) -> (i32, i32) {
    %c0_i32 = arith.constant 0 : i32
    %c0_i32_0 = arith.constant 0 : i32
    return %arg0, %c0_i32 : i32, i32
  }
}

module attributes {stable_mosaic.version = 11 : i64} {
  func.func @_matmul_stats_kernel(%arg0: i32, %arg1: memref<256x256xbf16, #tpu.memory_space<vmem>>, %arg2: memref<256x128xbf16, #tpu.memory_space<vmem>>, %arg3: memref<256x128xf32, #tpu.memory_space<vmem>>, %arg4: memref<1x128xf32, #tpu.memory_space<vmem>>, %arg5: memref<1x128xf32, #tpu.memory_space<vmem>>) attributes {dimension_semantics = [#tpu.dimension_semantics<arbitrary>], iteration_bounds = array<i64: 2>, scalar_prefetch = 0 : i64, scratch_operands = 0 : i64, tpu.core_type = #tpu.core_type<tc>, window_params = [{transform_indices = @transform_0, window_bounds = array<i64: 256, 256>}, {pipeline_mode = #tpu.pipeline_mode<synchronous>, transform_indices = @transform_1, window_bounds = array<i64: 256, 128>}, {transform_indices = @transform_2, window_bounds = array<i64: 256, 128>}, {pipeline_mode = #tpu.pipeline_mode<synchronous>, transform_indices = @transform_3, window_bounds = array<i64: 1, 128>}, {pipeline_mode = #tpu.pipeline_mode<synchronous>, transform_indices = @transform_4, window_bounds = array<i64: 1, 128>}]} {
    %c0 = arith.constant 0 : index
    %c0_0 = arith.constant 0 : index
    %0 = vector.load %arg1[%c0, %c0_0] : memref<256x256xbf16, #tpu.memory_space<vmem>>, vector<256x256xbf16>
    %c0_1 = arith.constant 0 : index
    %c0_2 = arith.constant 0 : index
    %1 = vector.load %arg2[%c0_1, %c0_2] : memref<256x128xbf16, #tpu.memory_space<vmem>>, vector<256x128xbf16>
    %cst = arith.constant dense<0.000000e+00> : vector<256x128xf32>
    %2 = tpu.matmul %0, %1, %cst {dimension_numbers = #tpu.dot_dimension_numbers<[1], [0], [0], [1], [0, 0, 1, 1], [], []>} : vector<256x256xbf16>, vector<256x128xbf16>, vector<256x128xf32> -> vector<256x128xf32>
    %c0_3 = arith.constant 0 : index
    %c0_4 = arith.constant 0 : index
    %3 = vector.load %arg3[%c0_3, %c0_4] : memref<256x128xf32, #tpu.memory_space<vmem>>, vector<256x128xf32>
    tpu.vector_store %arg3[%c0_3, %c0_4], %2 {strides = array<i32>} : memref<256x128xf32, #tpu.memory_space<vmem>>, vector<256x128xf32>,
    %c0_i32 = arith.constant 0 : i32
    %4 = arith.cmpi eq, %arg0, %c0_i32 : i32
    %5 = arith.extui %4 : i1 to i32
    %c0_i32_5 = arith.constant 0 : i32
    %6 = arith.cmpi ne, %5, %c0_i32_5 : i32
    scf.if %6 {
      %cst_16 = arith.constant 0.000000e+00 : f32
      %18 = vector.broadcast %cst_16 : f32 to vector<1x128xf32>
      %c0_17 = arith.constant 0 : index
      %c0_18 = arith.constant 0 : index
      %19 = vector.load %arg4[%c0_17, %c0_18] : memref<1x128xf32, #tpu.memory_space<vmem>>, vector<1x128xf32>
      tpu.vector_store %arg4[%c0_17, %c0_18], %18 {strides = array<i32>} : memref<1x128xf32, #tpu.memory_space<vmem>>, vector<1x128xf32>,
      %cst_19 = arith.constant 0.000000e+00 : f32
      %20 = vector.broadcast %cst_19 : f32 to vector<1x128xf32>
      %c0_20 = arith.constant 0 : index
      %c0_21 = arith.constant 0 : index
      %21 = vector.load %arg5[%c0_20, %c0_21] : memref<1x128xf32, #tpu.memory_space<vmem>>, vector<1x128xf32>
      tpu.vector_store %arg5[%c0_20, %c0_21], %20 {strides = array<i32>} : memref<1x128xf32, #tpu.memory_space<vmem>>, vector<1x128xf32>,
    } else {
    }
    %c0_6 = arith.constant 0 : index
    %c0_7 = arith.constant 0 : index
    %7 = vector.load %arg4[%c0_6, %c0_7] : memref<1x128xf32, #tpu.memory_space<vmem>>, vector<1x128xf32>
    %cst_8 = arith.constant dense<0.000000e+00> : vector<128xf32>
    %8 = vector.multi_reduction <add>, %2, %cst_8 [0] : vector<256x128xf32> to vector<128xf32>
    %9 = vector.shape_cast %8 : vector<128xf32> to vector<1x128xf32>
    %10 = arith.addf %7, %9 : vector<1x128xf32>
    %c0_9 = arith.constant 0 : index
    %c0_10 = arith.constant 0 : index
    %11 = vector.load %arg4[%c0_9, %c0_10] : memref<1x128xf32, #tpu.memory_space<vmem>>, vector<1x128xf32>
    tpu.vector_store %arg4[%c0_9, %c0_10], %10 {strides = array<i32>} : memref<1x128xf32, #tpu.memory_space<vmem>>, vector<1x128xf32>,
    %c0_11 = arith.constant 0 : index
    %c0_12 = arith.constant 0 : index
    %12 = vector.load %arg5[%c0_11, %c0_12] : memref<1x128xf32, #tpu.memory_space<vmem>>, vector<1x128xf32>
    %13 = arith.mulf %2, %2 : vector<256x128xf32>
    %cst_13 = arith.constant dense<0.000000e+00> : vector<128xf32>
    %14 = vector.multi_reduction <add>, %13, %cst_13 [0] : vector<256x128xf32> to vector<128xf32>
    %15 = vector.shape_cast %14 : vector<128xf32> to vector<1x128xf32>
    %16 = arith.addf %12, %15 : vector<1x128xf32>
    %c0_14 = arith.constant 0 : index
    %c0_15 = arith.constant 0 : index
    %17 = vector.load %arg5[%c0_14, %c0_15] : memref<1x128xf32, #tpu.memory_space<vmem>>, vector<1x128xf32>
    tpu.vector_store %arg5[%c0_14, %c0_15], %16 {strides = array<i32>} : memref<1x128xf32, #tpu.memory_space<vmem>>, vector<1x128xf32>,
    return
  }
  func.func @transform_0(%arg0: i32) -> (i32, i32) {
    %c0_i32 = arith.constant 0 : i32
    %c0_i32_0 = arith.constant 0 : i32
    return %arg0, %c0_i32 : i32, i32
  }
  func.func @transform_1(%arg0: i32) -> (i32, i32) {
    %c0_i32 = arith.constant 0 : i32
    %c0_i32_0 = arith.constant 0 : i32
    %c0_i32_1 = arith.constant 0 : i32
    return %c0_i32, %c0_i32_0 : i32, i32
  }
  func.func @transform_2(%arg0: i32) -> (i32, i32) {
    %c0_i32 = arith.constant 0 : i32
    %c0_i32_0 = arith.constant 0 : i32
    return %arg0, %c0_i32 : i32, i32
  }
  func.func @transform_3(%arg0: i32) -> (i32, i32) {
    %c0_i32 = arith.constant 0 : i32
    %c0_i32_0 = arith.constant 0 : i32
    %c0_i32_1 = arith.constant 0 : i32
    return %c0_i32, %c0_i32_0 : i32, i32
  }
  func.func @transform_4(%arg0: i32) -> (i32, i32) {
    %c0_i32 = arith.constant 0 : i32
    %c0_i32_0 = arith.constant 0 : i32
    %c0_i32_1 = arith.constant 0 : i32
    return %c0_i32, %c0_i32_0 : i32, i32
  }
}

module attributes {stable_mosaic.version = 11 : i64} {
  func.func @_bn_add_relu_kernel(%arg0: i32, %arg1: memref<256x128xf32, #tpu.memory_space<vmem>>, %arg2: memref<256x128xf32, #tpu.memory_space<vmem>>, %arg3: memref<1x128xf32, #tpu.memory_space<vmem>>, %arg4: memref<1x128xf32, #tpu.memory_space<vmem>>, %arg5: memref<1x128xf32, #tpu.memory_space<vmem>>, %arg6: memref<1x128xf32, #tpu.memory_space<vmem>>, %arg7: memref<256x128xf32, #tpu.memory_space<vmem>>) attributes {dimension_semantics = [#tpu.dimension_semantics<parallel>], iteration_bounds = array<i64: 2>, scalar_prefetch = 0 : i64, scratch_operands = 0 : i64, tpu.core_type = #tpu.core_type<tc>, window_params = [{transform_indices = @transform_0, window_bounds = array<i64: 256, 128>}, {transform_indices = @transform_1, window_bounds = array<i64: 256, 128>}, {pipeline_mode = #tpu.pipeline_mode<synchronous>, transform_indices = @transform_2, window_bounds = array<i64: 1, 128>}, {pipeline_mode = #tpu.pipeline_mode<synchronous>, transform_indices = @transform_3, window_bounds = array<i64: 1, 128>}, {pipeline_mode = #tpu.pipeline_mode<synchronous>, transform_indices = @transform_4, window_bounds = array<i64: 1, 128>}, {pipeline_mode = #tpu.pipeline_mode<synchronous>, transform_indices = @transform_5, window_bounds = array<i64: 1, 128>}, {transform_indices = @transform_6, window_bounds = array<i64: 256, 128>}]} {
    %c0 = arith.constant 0 : index
    %c0_0 = arith.constant 0 : index
    %0 = vector.load %arg1[%c0, %c0_0] : memref<256x128xf32, #tpu.memory_space<vmem>>, vector<256x128xf32>
    %c0_1 = arith.constant 0 : index
    %c0_2 = arith.constant 0 : index
    %1 = vector.load %arg3[%c0_1, %c0_2] : memref<1x128xf32, #tpu.memory_space<vmem>>, vector<1x128xf32>
    %2 = vector.broadcast %1 : vector<1x128xf32> to vector<256x128xf32>
    %3 = arith.mulf %0, %2 : vector<256x128xf32>
    %c0_3 = arith.constant 0 : index
    %c0_4 = arith.constant 0 : index
    %4 = vector.load %arg4[%c0_3, %c0_4] : memref<1x128xf32, #tpu.memory_space<vmem>>, vector<1x128xf32>
    %5 = vector.broadcast %4 : vector<1x128xf32> to vector<256x128xf32>
    %6 = arith.addf %3, %5 : vector<256x128xf32>
    %c0_5 = arith.constant 0 : index
    %c0_6 = arith.constant 0 : index
    %7 = vector.load %arg2[%c0_5, %c0_6] : memref<256x128xf32, #tpu.memory_space<vmem>>, vector<256x128xf32>
    %c0_7 = arith.constant 0 : index
    %c0_8 = arith.constant 0 : index
    %8 = vector.load %arg5[%c0_7, %c0_8] : memref<1x128xf32, #tpu.memory_space<vmem>>, vector<1x128xf32>
    %9 = vector.broadcast %8 : vector<1x128xf32> to vector<256x128xf32>
    %10 = arith.mulf %7, %9 : vector<256x128xf32>
    %11 = arith.addf %6, %10 : vector<256x128xf32>
    %c0_9 = arith.constant 0 : index
    %c0_10 = arith.constant 0 : index
    %12 = vector.load %arg6[%c0_9, %c0_10] : memref<1x128xf32, #tpu.memory_space<vmem>>, vector<1x128xf32>
    %13 = vector.broadcast %12 : vector<1x128xf32> to vector<256x128xf32>
    %14 = arith.addf %11, %13 : vector<256x128xf32>
    %cst = arith.constant 0.000000e+00 : f32
    %15 = vector.broadcast %cst : f32 to vector<256x128xf32>
    %16 = arith.maximumf %14, %15 : vector<256x128xf32>
    %c0_11 = arith.constant 0 : index
    %c0_12 = arith.constant 0 : index
    %17 = vector.load %arg7[%c0_11, %c0_12] : memref<256x128xf32, #tpu.memory_space<vmem>>, vector<256x128xf32>
    tpu.vector_store %arg7[%c0_11, %c0_12], %16 {strides = array<i32>} : memref<256x128xf32, #tpu.memory_space<vmem>>, vector<256x128xf32>,
    return
  }
  func.func @transform_0(%arg0: i32) -> (i32, i32) {
    %c0_i32 = arith.constant 0 : i32
    %c0_i32_0 = arith.constant 0 : i32
    return %arg0, %c0_i32 : i32, i32
  }
  func.func @transform_1(%arg0: i32) -> (i32, i32) {
    %c0_i32 = arith.constant 0 : i32
    %c0_i32_0 = arith.constant 0 : i32
    return %arg0, %c0_i32 : i32, i32
  }
  func.func @transform_2(%arg0: i32) -> (i32, i32) {
    %c0_i32 = arith.constant 0 : i32
    %c0_i32_0 = arith.constant 0 : i32
    %c0_i32_1 = arith.constant 0 : i32
    return %c0_i32, %c0_i32_0 : i32, i32
  }
  func.func @transform_3(%arg0: i32) -> (i32, i32) {
    %c0_i32 = arith.constant 0 : i32
    %c0_i32_0 = arith.constant 0 : i32
    %c0_i32_1 = arith.constant 0 : i32
    return %c0_i32, %c0_i32_0 : i32, i32
  }
  func.func @transform_4(%arg0: i32) -> (i32, i32) {
    %c0_i32 = arith.constant 0 : i32
    %c0_i32_0 = arith.constant 0 : i32
    %c0_i32_1 = arith.constant 0 : i32
    return %c0_i32, %c0_i32_0 : i32, i32
  }
  func.func @transform_5(%arg0: i32) -> (i32, i32) {
    %c0_i32 = arith.constant 0 : i32
    %c0_i32_0 = arith.constant 0 : i32
    %c0_i32_1 = arith.constant 0 : i32
    return %c0_i32, %c0_i32_0 : i32, i32
  }
  func.func @transform_6(%arg0: i32) -> (i32, i32) {
    %c0_i32 = arith.constant 0 : i32
    %c0_i32_0 = arith.constant 0 : i32
    return %arg0, %c0_i32 : i32, i32
  }
}

</mosaic_0001>

<bundles_post_ra>
// kernel: residual_block.6
= control target key start
LH: loop header
LB: loop body
LE: loop exit
PB: predicated region body
PF: predicated region fallthrough
CT: control target
= control target key end

     0   :  { %s453_s12 = smov 0   ;;  %s612_s0 = inlined_call_operand.vmem [shape: f32[512,128], index: 0, kind: input, shape index: {}]   ;;  %s613_s1 = inlined_call_operand.vmem [shape: f32[1,128], index: 1, kind: input, shape index: {}]   ;;  %s614_s2 = inlined_call_operand.vmem [shape: f32[1,128], index: 2, kind: input, shape index: {}]   ;;  %s615_s3 = inlined_call_operand.vmem [shape: f32[512,128], index: 3, kind: output, shape index: {}]  }
   0x1 LB: > { %s404_s13 = sadd.s32 4294967295, %s431_s12   ;;  %p408_p0 = scmp.ge.s32.totalorder %s431_s12, 1  ;;  %s431_s12 = sphi %s453_s12, %s13_s12  }
   0x2   : > { %p138_p1 = scmp.lt.s32.totalorder %s431_s12, 3 }
   0x4   : > { %p139_p2 = pnand %p408_p0, %p138_p1 }
   0x5   : > { %s409_s14 = sshll.u32 (!%p139_p2), %s404_s13, 5  ;;  %v464_v0 = vld [vmem:[%s613_s1] ss:$0 sm:$0xff] (!%p139_p2) }
   0x6   : > { %142 = sbr.rel (%p139_p2) target bundleno = 46 (0x2e), region = 32  ;;  %p163_p3 = scmp.lt.s32.totalorder (!%p139_p2), %s409_s14, 63  ;;  %v474_v1 = vld [vmem:[%s614_s2] ss:$0 sm:$0xff] (!%p139_p2) }
   0xd   : > { %s617_s14 = smov (!%p163_p3, %s409_s14), 63 }
   0xe   : > { %s410_s15 = sshll.u32 %s617_s14, 3 }
   0xf   : > { %s469_s20 = scalar_lea.vmem %s612_s0, %s410_s15  ;;  %s497_s25 = scalar_lea.vmem %s615_s3, %s410_s15 }
  0x10   : > { %v174_v2 = vld [vmem:[%s469_s20] sm:$0xff]  ;;  %v175_v3 = vld [vmem:[%s469_s20 + $0x8] sm:$0xff]  ;;  %v176_v4 = vld [vmem:[%s469_s20 + $0x10] sm:$0xff] }
  0x11   : > { %v213_v5 = vmul.f32 %v464_v0, %v174_v2  ;;  %v214_v6 = vmul.f32 %v464_v0, %v175_v3  ;;  %v215_v7 = vmul.f32 %v464_v0, %v176_v4  ;;  %v177_v8 = vld [vmem:[%s469_s20 + $0x18] sm:$0xff]  ;;  %v178_v9 = vld [vmem:[%s469_s20 + $0x20] sm:$0xff]  ;;  %v179_v10 = vld [vmem:[%s469_s20 + $0x28] sm:$0xff] }
  0x12   : > { %v216_v11 = vmul.f32 %v464_v0, %v177_v8  ;;  %v217_v12 = vmul.f32 %v464_v0, %v178_v9  ;;  %v218_v13 = vmul.f32 %v464_v0, %v179_v10  ;;  %v180_v14 = vld [vmem:[%s469_s20 + $0x30] sm:$0xff]  ;;  %v181_v15 = vld [vmem:[%s469_s20 + $0x38] sm:$0xff]  ;;  %v182_v24 = vld [vmem:[%s469_s20 + $0x40] sm:$0xff] }
  0x13   : > { %v252_v16 = vadd.f32 %v474_v1, %v213_v5  ;;  %v253_v17 = vadd.f32 %v474_v1, %v214_v6  ;;  %v254_v18 = vadd.f32 %v474_v1, %v215_v7  ;;  %v219_v19 = vmul.f32 %v464_v0, %v180_v14  ;;  %v183_v25 = vld [vmem:[%s469_s20 + $0x48] sm:$0xff]  ;;  %v184_v26 = vld [vmem:[%s469_s20 + $0x50] sm:$0xff]  ;;  %v185_v31 = vld [vmem:[%s469_s20 + $0x58] sm:$0xff] }
  0x14   : > { %v255_v20 = vadd.f32 %v474_v1, %v216_v11  ;;  %v256_v21 = vadd.f32 %v474_v1, %v217_v12  ;;  %v257_v22 = vadd.f32 %v474_v1, %v218_v13  ;;  %v220_v23 = vmul.f32 %v464_v0, %v181_v15  ;;  %v186_v32 = vld [vmem:[%s469_s20 + $0x60] sm:$0xff]  ;;  %v187_v33 = vld [vmem:[%s469_s20 + $0x68] sm:$0xff]  ;;  %v188_v38 = vld [vmem:[%s469_s20 + $0x70] sm:$0xff] }
  0x15   : > { %v284_v27 = vmax.f32 %v252_v16, 0.0  ;;  %v285_v28 = vmax.f32 %v253_v17, 0.0  ;;  %v286_v29 = vmax.f32 %v254_v18, 0.0  ;;  %v258_v30 = vadd.f32 %v474_v1, %v219_v19  ;;  %v189_v43 = vld [vmem:[%s469_s20 + $0x78] sm:$0xff]  ;;  %v190_v56 = vld [vmem:[%s469_s20 + $0x80] sm:$0xff]  ;;  %v191_v57 = vld [vmem:[%s469_s20 + $0x88] sm:$0xff] }
  0x16   : > { %v287_v34 = vmax.f32 %v255_v20, 0.0  ;;  %v288_v35 = vmax.f32 %v256_v21, 0.0  ;;  %v289_v36 = vmax.f32 %v257_v22, 0.0  ;;  %v259_v37 = vadd.f32 %v474_v1, %v220_v23  ;;  %v192_v58 = vld [vmem:[%s469_s20 + $0x90] sm:$0xff]  ;;  %v193_v63 = vld [vmem:[%s469_s20 + $0x98] sm:$0xff]  ;;  %v194_v2 = vld [vmem:[%s469_s20 + $0xa0] sm:$0xff] }
  0x17   : > { %316 = vst [vmem:[%s497_s25] sm:$0xff] %v284_v27  ;;  %317 = vst [vmem:[%s497_s25 + $0x8] sm:$0xff] %v285_v28  ;;  %v290_v39 = vmax.f32 %v258_v30, 0.0  ;;  %v221_v40 = vmul.f32 %v464_v0, %v182_v24  ;;  %v222_v41 = vmul.f32 %v464_v0, %v183_v25  ;;  %v223_v42 = vmul.f32 %v464_v0, %v184_v26  ;;  %v195_v3 = vld [vmem:[%s469_s20 + $0xa8] sm:$0xff]  ;;  %v196_v8 = vld [vmem:[%s469_s20 + $0xb0] sm:$0xff] }
  0x18   : > { %318 = vst [vmem:[%s497_s25 + $0x10] sm:$0xff] %v286_v29  ;;  %319 = vst [vmem:[%s497_s25 + $0x18] sm:$0xff] %v287_v34  ;;  %v291_v44 = vmax.f32 %v259_v37, 0.0  ;;  %v224_v45 = vmul.f32 %v464_v0, %v185_v31  ;;  %v225_v46 = vmul.f32 %v464_v0, %v186_v32  ;;  %v226_v47 = vmul.f32 %v464_v0, %v187_v33  ;;  %v197_v13 = vld [vmem:[%s469_s20 + $0xb8] sm:$0xff]  ;;  %v198_v26 = vld [vmem:[%s469_s20 + $0xc0] sm:$0xff] }
  0x19   : > { %320 = vst [vmem:[%s497_s25 + $0x20] sm:$0xff] %v288_v35  ;;  %321 = vst [vmem:[%s497_s25 + $0x28] sm:$0xff] %v289_v36  ;;  %v260_v48 = vadd.f32 %v474_v1, %v221_v40  ;;  %v261_v49 = vadd.f32 %v474_v1, %v222_v41  ;;  %v262_v50 = vadd.f32 %v474_v1, %v223_v42  ;;  %v199_v27 = vld [vmem:[%s469_s20 + $0xc8] sm:$0xff]  ;;  %v200_v28 = vld [vmem:[%s469_s20 + $0xd0] sm:$0xff] }
  0x1a   : > { %322 = vst [vmem:[%s497_s25 + $0x30] sm:$0xff] %v290_v39  ;;  %v227_v51 = vmul.f32 %v464_v0, %v188_v38  ;;  %323 = vst [vmem:[%s497_s25 + $0x38] sm:$0xff] %v291_v44  ;;  %v263_v52 = vadd.f32 %v474_v1, %v224_v45  ;;  %v264_v53 = vadd.f32 %v474_v1, %v225_v46  ;;  %v201_v33 = vld [vmem:[%s469_s20 + $0xd8] sm:$0xff]  ;;  %v202_v34 = vld [vmem:[%s469_s20 + $0xe0] sm:$0xff] }
  0x1b   : > { %v265_v54 = vadd.f32 %v474_v1, %v226_v47  ;;  %v228_v55 = vmul.f32 %v464_v0, %v189_v43  ;;  %v292_v59 = vmax.f32 %v260_v48, 0.0  ;;  %v293_v60 = vmax.f32 %v261_v49, 0.0  ;;  %v203_v35 = vld [vmem:[%s469_s20 + $0xe8] sm:$0xff]  ;;  %v204_v40 = vld [vmem:[%s469_s20 + $0xf0] sm:$0xff]  ;;  %v205_v45 = vld [vmem:[%s469_s20 + $0xf8] sm:$0xff] }
  0x1c   : > { %v294_v61 = vmax.f32 %v262_v50, 0.0  ;;  %v266_v62 = vadd.f32 %v474_v1, %v227_v51  ;;  %v295_v4 = vmax.f32 %v263_v52, 0.0  ;;  %v296_v5 = vmax.f32 %v264_v53, 0.0 }
  0x1d   : > { %v297_v6 = vmax.f32 %v265_v54, 0.0  ;;  %v267_v7 = vadd.f32 %v474_v1, %v228_v55  ;;  %324 = vst [vmem:[%s497_s25 + $0x40] sm:$0xff] %v292_v59  ;;  %325 = vst [vmem:[%s497_s25 + $0x48] sm:$0xff] %v293_v60  ;;  %v229_v10 = vmul.f32 %v464_v0, %v190_v56  ;;  %v230_v11 = vmul.f32 %v464_v0, %v191_v57 }
  0x1e   : > { %326 = vst [vmem:[%s497_s25 + $0x50] sm:$0xff] %v294_v61  ;;  %v298_v9 = vmax.f32 %v266_v62, 0.0  ;;  %v231_v12 = vmul.f32 %v464_v0, %v192_v58  ;;  %327 = vst [vmem:[%s497_s25 + $0x58] sm:$0xff] %v295_v4  ;;  %v232_v15 = vmul.f32 %v464_v0, %v193_v63  ;;  %v233_v16 = vmul.f32 %v464_v0, %v194_v2 }
  0x1f   : > { %328 = vst [vmem:[%s497_s25 + $0x60] sm:$0xff] %v296_v5  ;;  %329 = vst [vmem:[%s497_s25 + $0x68] sm:$0xff] %v297_v6  ;;  %v299_v14 = vmax.f32 %v267_v7, 0.0  ;;  %v234_v17 = vmul.f32 %v464_v0, %v195_v3  ;;  %v268_v18 = vadd.f32 %v474_v1, %v229_v10  ;;  %v269_v19 = vadd.f32 %v474_v1, %v230_v11 }
  0x20   : > { %330 = vst [vmem:[%s497_s25 + $0x70] sm:$0xff] %v298_v9  ;;  %v270_v20 = vadd.f32 %v474_v1, %v231_v12  ;;  %v235_v21 = vmul.f32 %v464_v0, %v196_v8  ;;  %v271_v22 = vadd.f32 %v474_v1, %v232_v15  ;;  %v272_v23 = vadd.f32 %v474_v1, %v233_v16 }
  0x21   : > { %331 = vst [vmem:[%s497_s25 + $0x78] sm:$0xff] %v299_v14  ;;  %v273_v24 = vadd.f32 %v474_v1, %v234_v17  ;;  %v236_v25 = vmul.f32 %v464_v0, %v197_v13  ;;  %v300_v29 = vmax.f32 %v268_v18, 0.0  ;;  %v301_v30 = vmax.f32 %v269_v19, 0.0 }
  0x22   : > { %v302_v31 = vmax.f32 %v270_v20, 0.0  ;;  %v274_v32 = vadd.f32 %v474_v1, %v235_v21  ;;  %v303_v36 = vmax.f32 %v271_v22, 0.0  ;;  %v304_v37 = vmax.f32 %v272_v23, 0.0 }
  0x23   : > { %v305_v38 = vmax.f32 %v273_v24, 0.0  ;;  %v275_v39 = vadd.f32 %v474_v1, %v236_v25  ;;  %332 = vst [vmem:[%s497_s25 + $0x80] sm:$0xff] %v300_v29  ;;  %333 = vst [vmem:[%s497_s25 + $0x88] sm:$0xff] %v301_v30  ;;  %v237_v42 = vmul.f32 %v464_v0, %v198_v26  ;;  %v238_v43 = vmul.f32 %v464_v0, %v199_v27 }
  0x24   : > { %334 = vst [vmem:[%s497_s25 + $0x90] sm:$0xff] %v302_v31  ;;  %v306_v41 = vmax.f32 %v274_v32, 0.0  ;;  %v239_v44 = vmul.f32 %v464_v0, %v200_v28  ;;  %335 = vst [vmem:[%s497_s25 + $0x98] sm:$0xff] %v303_v36  ;;  %v240_v47 = vmul.f32 %v464_v0, %v201_v33  ;;  %v241_v48 = vmul.f32 %v464_v0, %v202_v34 }
  0x25   : > { %336 = vst [vmem:[%s497_s25 + $0xa0] sm:$0xff] %v304_v37  ;;  %337 = vst [vmem:[%s497_s25 + $0xa8] sm:$0xff] %v305_v38  ;;  %v307_v46 = vmax.f32 %v275_v39, 0.0  ;;  %v242_v49 = vmul.f32 %v464_v0, %v203_v35  ;;  %v276_v50 = vadd.f32 %v474_v1, %v237_v42  ;;  %v277_v51 = vadd.f32 %v474_v1, %v238_v43 }
  0x26   : > { %338 = vst [vmem:[%s497_s25 + $0xb0] sm:$0xff] %v306_v41  ;;  %v278_v52 = vadd.f32 %v474_v1, %v239_v44  ;;  %v243_v53 = vmul.f32 %v464_v0, %v204_v40  ;;  %v279_v54 = vadd.f32 %v474_v1, %v240_v47  ;;  %v280_v55 = vadd.f32 %v474_v1, %v241_v48 }
  0x27   : > { %339 = vst [vmem:[%s497_s25 + $0xb8] sm:$0xff] %v307_v46  ;;  %v281_v56 = vadd.f32 %v474_v1, %v242_v49  ;;  %v244_v57 = vmul.f32 %v464_v0, %v205_v45  ;;  %v308_v58 = vmax.f32 %v276_v50, 0.0  ;;  %v309_v59 = vmax.f32 %v277_v51, 0.0 }
  0x28   : > { %v310_v60 = vmax.f32 %v278_v52, 0.0  ;;  %v282_v61 = vadd.f32 %v474_v1, %v243_v53  ;;  %v311_v62 = vmax.f32 %v279_v54, 0.0  ;;  %v312_v63 = vmax.f32 %v280_v55, 0.0 }
  0x29   : > { %v313_v2 = vmax.f32 %v281_v56, 0.0  ;;  %v283_v3 = vadd.f32 %v474_v1, %v244_v57  ;;  %340 = vst [vmem:[%s497_s25 + $0xc0] sm:$0xff] %v308_v58  ;;  %341 = vst [vmem:[%s497_s25 + $0xc8] sm:$0xff] %v309_v59 }
  0x2a   : > { %342 = vst [vmem:[%s497_s25 + $0xd0] sm:$0xff] %v310_v60  ;;  %v314_v4 = vmax.f32 %v282_v61, 0.0  ;;  %343 = vst [vmem:[%s497_s25 + $0xd8] sm:$0xff] %v311_v62 }
  0x2b   : > { %344 = vst [vmem:[%s497_s25 + $0xe0] sm:$0xff] %v312_v63  ;;  %345 = vst [vmem:[%s497_s25 + $0xe8] sm:$0xff] %v313_v2  ;;  %v315_v0 = vmax.f32 %v283_v3, 0.0 }
  0x2c   : > { %346 = vst [vmem:[%s497_s25 + $0xf0] sm:$0xff] %v314_v4 }
  0x2d   : > { %347 = vst [vmem:[%s497_s25 + $0xf8] sm:$0xff] %v315_v0 }
  0x2e PF: > { %s13_s12 = sadd.s32 1, %s431_s12  }
  0x2f   : > { %p10_p4 = scmp.ge.s32.totalorder %s13_s12, 4  }
  0x31   :  { %12 = sbr.rel (!%p10_p4) target bundleno = 1 (0x1), region = 62 }

// kernel: residual_block.5
= control target key start
LH: loop header
LB: loop body
LE: loop exit
PB: predicated region body
PF: predicated region fallthrough
CT: control target
= control target key end

     0   :  { %s959_s15 = smov 0   ;;  %s1216_s0 = inlined_call_operand.vmem [shape: bf16[512,128], index: 0, kind: input, shape index: {}]   ;;  %s1217_s1 = inlined_call_operand.vmem [shape: bf16[128,128], index: 1, kind: input, shape index: {}]   ;;  %s1218_s2 = inlined_call_operand.vmem [shape: f32[512,128], index: 2, kind: output, shape index: {0}]   ;;  %s1219_s3 = inlined_call_operand.vmem [shape: f32[1,128], index: 3, kind: output, shape index: {1}]   ;;  %s1220_s4 = inlined_call_operand.vmem [shape: f32[1,128], index: 4, kind: output, shape index: {2}]  }
   0x1 LB: > { %s768_s16 = sadd.s32 4294967295, %s931_s15   ;;  %p772_p0 = scmp.ge.s32.totalorder %s931_s15, 1  ;;  %s931_s15 = sphi %s959_s15, %s15_s15  }
   0x2   : > { %p158_p1 = scmp.lt.s32.totalorder %s931_s15, 3 }
   0x4   : > { %p159_p2 = pnand %p772_p0, %p158_p1 }
   0x5   : > { %v901_v0 = vld [vmem:[%s1217_s1] sm:$0xff] (!%p159_p2)   ;;  %s773_s19 = sshll.u32 (!%p159_p2), %s768_s16, 5  ;;  %v902_v1 = vld [vmem:[%s1217_s1 + $0x8] sm:$0xff] (!%p159_p2)   ;;  %v903_v2 = vld [vmem:[%s1217_s1 + $0x10] sm:$0xff] (!%p159_p2)   ;;  %p801_p4 = scmp.ne.s32.totalorder (!%p159_p2), %s768_s16, 0 }
   0x6   : > { %162 = sbr.rel (%p159_p2) target bundleno = 357 (0x165), region = 28  ;;  %p185_p3 = scmp.lt.s32.totalorder (!%p159_p2), %s773_s19, 63  ;;  %828 = vmatprep.subr.bf16.mxu0 (!%p159_p2), %v901_v0  ;;  %876 = vmatprep.subr.bf16.mxu1 (!%p159_p2), %v901_v0  ;;  %v904_v3 = vld [vmem:[%s1217_s1 + $0x18] sm:$0xff] (!%p159_p2)   ;;  %v905_v6 = vld [vmem:[%s1217_s1 + $0x20] sm:$0xff] (!%p159_p2)   ;;  %v906_v7 = vld [vmem:[%s1217_s1 + $0x28] sm:$0xff] (!%p159_p2)  }
   0x7   : > { %829 = vmatpush3.bf16.msra.mxu0 (!%p159_p2), %v901_v0  ;;  %884 = vmatpush3.bf16.msra.mxu1 (!%p159_p2), %v901_v0  ;;  %v907_v8 = vld [vmem:[%s1217_s1 + $0x30] sm:$0xff] (!%p159_p2)   ;;  %v908_v9 = vld [vmem:[%s1217_s1 + $0x38] sm:$0xff] (!%p159_p2)  }
   0x8   : > { %830 = vmatprep.subr.bf16.mxu0 (!%p159_p2), %v902_v1  ;;  %877 = vmatprep.subr.bf16.mxu1 (!%p159_p2), %v902_v1 }
   0xb   : > { %831 = vmatpush3.bf16.msra.mxu0 (!%p159_p2), %v902_v1  ;;  %885 = vmatpush3.bf16.msra.mxu1 (!%p159_p2), %v902_v1 }
   0xc   : > { %832 = vmatprep.subr.bf16.mxu0 (!%p159_p2), %v903_v2  ;;  %878 = vmatprep.subr.bf16.mxu1 (!%p159_p2), %v903_v2 }
   0xd   : > { %s1222_s19 = smov (!%p185_p3, %s773_s19), 63  ;;  %v933_v56 = vmov (!%p801_p4), 0.0  }
   0xe   : > { %s774_s24 = sshll.u32 %s1222_s19, 2  ;;  %s776_s12 = sshll.u32 %s1222_s19, 3  ;;  %586 = vst [vmem:[%s1219_s3] sm:$0x1] (!%p801_p4), %v933_v56  ;;  %587 = vst [vmem:[%s1220_s4] sm:$0x1] (!%p801_p4), %v933_v56 }
   0xf   : > { %s984_s27 = scalar_lea.vmem %s1216_s0, %s774_s24  ;;  %833 = vmatpush3.bf16.msra.mxu0 %v903_v2  ;;  %886 = vmatpush3.bf16.msra.mxu1 %v903_v2  ;;  %s1021_s17 = scalar_lea.vmem %s1218_s2, %s776_s12 }
  0x10   : > { %v909_v4 = vld [vmem:[%s984_s27] sm:$0xff]   ;;  %834 = vmatprep.subr.bf16.mxu0 %v904_v3  ;;  %879 = vmatprep.subr.bf16.mxu1 %v904_v3  ;;  %v911_v10 = vld [vmem:[%s984_s27 + $0x8] sm:$0xff]   ;;  %v913_v12 = vld [vmem:[%s984_s27 + $0x10] sm:$0xff]  }
  0x11   : > { %v910_v5 = vld [vmem:[%s984_s27 + $0x40] sm:$0xff]   ;;  %844 = vmatprep.mubr.bf16.mxu0 %v909_v4  ;;  %v912_v11 = vld [vmem:[%s984_s27 + $0x48] sm:$0xff]   ;;  %v914_v13 = vld [vmem:[%s984_s27 + $0x50] sm:$0xff]  }
  0x12   : > { %860 = vmatprep.mubr.bf16.mxu1 %v910_v5  ;;  %v915_v14 = vld [vmem:[%s984_s27 + $0x18] sm:$0xff]   ;;  %v917_v16 = vld [vmem:[%s984_s27 + $0x20] sm:$0xff]   ;;  %v919_v18 = vld [vmem:[%s984_s27 + $0x28] sm:$0xff]  }
  0x13   : > { %835 = vmatpush3.bf16.msra.mxu0 %v904_v3  ;;  %887 = vmatpush3.bf16.msra.mxu1 %v904_v3  ;;  %v916_v15 = vld [vmem:[%s984_s27 + $0x58] sm:$0xff]   ;;  %v918_v17 = vld [vmem:[%s984_s27 + $0x60] sm:$0xff]   ;;  %v920_v19 = vld [vmem:[%s984_s27 + $0x68] sm:$0xff]  }
  0x14   : > { %836 = vmatprep.subr.bf16.mxu0 %v905_v6  ;;  %880 = vmatprep.subr.bf16.mxu1 %v905_v6  ;;  %v921_v20 = vld [vmem:[%s984_s27 + $0x30] sm:$0xff]   ;;  %v923_v22 = vld [vmem:[%s984_s27 + $0x38] sm:$0xff]  }
  0x15   : > { %v922_v21 = vld [vmem:[%s984_s27 + $0x70] sm:$0xff]   ;;  %v924_v23 = vld [vmem:[%s984_s27 + $0x78] sm:$0xff]  }
  0x17   : > { %837 = vmatpush3.bf16.msra.mxu0 %v905_v6  ;;  %888 = vmatpush3.bf16.msra.mxu1 %v905_v6 }
  0x18   : > { %838 = vmatprep.subr.bf16.mxu0 %v906_v7  ;;  %881 = vmatprep.subr.bf16.mxu1 %v906_v7 }
  0x1b   : > { %839 = vmatpush3.bf16.msra.mxu0 %v906_v7  ;;  %889 = vmatpush3.bf16.msra.mxu1 %v906_v7 }
  0x1c   : > { %840 = vmatprep.subr.bf16.mxu0 %v907_v8  ;;  %882 = vmatprep.subr.bf16.mxu1 %v907_v8 }
  0x1f   : > { %841 = vmatpush3.bf16.msra.mxu0 %v907_v8  ;;  %890 = vmatpush3.bf16.msra.mxu1 %v907_v8 }
  0x20   : > { %842 = vmatprep.subr.bf16.mxu0 %v908_v9  ;;  %883 = vmatprep.subr.bf16.mxu1 %v908_v9 }
  0x23   : > { %843 = vmatpush3.bf16.msra.mxu0 %v908_v9  ;;  %891 = vmatpush3.bf16.msra.mxu1 %v908_v9 }
  0x26   : > { %845 = vmatmul.mubr.bf16.vlgmr.msra.gmra.mrb[0].mxu0 %v911_v10  ;;  %861 = vmatmul.mubr.bf16.vlgmr.msra.gmra.mrb[0].mxu1 %v912_v11 }
  0x27   : > { %848 = vmatprep.mubr.bf16.mxu0 %v913_v12  ;;  %864 = vmatprep.mubr.bf16.mxu1 %v914_v13 }
  0x2e   : > { %849 = vmatmul.mubr.bf16.gmra.mrb[4].mxu0 %v915_v14  ;;  %865 = vmatmul.mubr.bf16.gmra.mrb[4].mxu1 %v916_v15 }
  0x2f   : > { %852 = vmatprep.mubr.bf16.mxu0 %v917_v16  ;;  %868 = vmatprep.mubr.bf16.mxu1 %v918_v17 }
  0x36   : > { %853 = vmatmul.mubr.bf16.gmra.mrb[8].mxu0 %v919_v18  ;;  %869 = vmatmul.mubr.bf16.gmra.mrb[8].mxu1 %v920_v19 }
  0x37   : > { %856 = vmatprep.mubr.bf16.mxu0 %v921_v20  ;;  %872 = vmatprep.mubr.bf16.mxu1 %v922_v21 }
  0x3e   : > { %857 = vmatmul.mubr.bf16.gmra.mrb[12].mxu0 %v923_v22  ;;  %873 = vmatmul.mubr.bf16.gmra.mrb[12].mxu1 %v924_v23 }
  0xf9   : > { %v1023_v24 = vpop.f32.mrb[0].mxu0  ;;  %v1025_v25 = vpop.f32.mrb[0].mxu1 }
  0xfa   : > { %552 = vst [vmem:[%s1021_s17 + $0x10] sm:$0xff] %v1023_v24  ;;  %568 = vst [vmem:[%s1021_s17 + $0x90] sm:$0xff] %v1025_v25  ;;  %v1031_v26 = vpop.f32.mrb[1].mxu0  ;;  %v1033_v27 = vpop.f32.mrb[1].mxu1 }
  0xfb   : > { %550 = vst [vmem:[%s1021_s17] sm:$0xff] %v1031_v26  ;;  %566 = vst [vmem:[%s1021_s17 + $0x80] sm:$0xff] %v1033_v27  ;;  %v1039_v28 = vpop.f32.mrb[2].mxu0  ;;  %v1041_v29 = vpop.f32.mrb[2].mxu1 }
  0xfc   : > { %553 = vst [vmem:[%s1021_s17 + $0x18] sm:$0xff] %v1039_v28  ;;  %569 = vst [vmem:[%s1021_s17 + $0x98] sm:$0xff] %v1041_v29  ;;  %v426_v30 = vpop.f32.mrb[3].mxu0  ;;  %v1047_v31 = vpop.f32.mrb[3].mxu1 }
  0xfd   : > { %551 = vst [vmem:[%s1021_s17 + $0x8] sm:$0xff] %v426_v30  ;;  %567 = vst [vmem:[%s1021_s17 + $0x88] sm:$0xff] %v1047_v31 }
 0x101   : > { %v1052_v32 = vpop.f32.mrb[4].mxu0  ;;  %v1054_v33 = vpop.f32.mrb[4].mxu1 }
 0x102   : > { %556 = vst [vmem:[%s1021_s17 + $0x30] sm:$0xff] %v1052_v32  ;;  %572 = vst [vmem:[%s1021_s17 + $0xb0] sm:$0xff] %v1054_v33  ;;  %v439_v34 = vpop.f32.mrb[5].mxu0  ;;  %v1060_v35 = vpop.f32.mrb[5].mxu1 }
 0x103   : > { %554 = vst [vmem:[%s1021_s17 + $0x20] sm:$0xff] %v439_v34  ;;  %570 = vst [vmem:[%s1021_s17 + $0xa0] sm:$0xff] %v1060_v35  ;;  %v1065_v36 = vpop.f32.mrb[6].mxu0  ;;  %v1067_v37 = vpop.f32.mrb[6].mxu1 }
 0x104   : > { %557 = vst [vmem:[%s1021_s17 + $0x38] sm:$0xff] %v1065_v36  ;;  %573 = vst [vmem:[%s1021_s17 + $0xb8] sm:$0xff] %v1067_v37  ;;  %v442_v38 = vpop.f32.mrb[7].mxu0  ;;  %v1073_v39 = vpop.f32.mrb[7].mxu1 }
 0x105   : > { %555 = vst [vmem:[%s1021_s17 + $0x28] sm:$0xff] %v442_v38  ;;  %571 = vst [vmem:[%s1021_s17 + $0xa8] sm:$0xff] %v1073_v39 }
 0x109   : > { %v1078_v40 = vpop.f32.mrb[8].mxu0  ;;  %v1080_v41 = vpop.f32.mrb[8].mxu1 }
 0x10a   : > { %560 = vst [vmem:[%s1021_s17 + $0x50] sm:$0xff] %v1078_v40  ;;  %576 = vst [vmem:[%s1021_s17 + $0xd0] sm:$0xff] %v1080_v41  ;;  %v455_v42 = vpop.f32.mrb[9].mxu0  ;;  %v1086_v43 = vpop.f32.mrb[9].mxu1 }
 0x10b   : > { %558 = vst [vmem:[%s1021_s17 + $0x40] sm:$0xff] %v455_v42  ;;  %574 = vst [vmem:[%s1021_s17 + $0xc0] sm:$0xff] %v1086_v43  ;;  %v855_v44 = vpop.f32.mrb[10].mxu0  ;;  %v1091_v45 = vpop.f32.mrb[10].mxu1 }
 0x10c   : > { %561 = vst [vmem:[%s1021_s17 + $0x58] sm:$0xff] %v855_v44  ;;  %577 = vst [vmem:[%s1021_s17 + $0xd8] sm:$0xff] %v1091_v45  ;;  %v458_v46 = vpop.f32.mrb[11].mxu0  ;;  %v1096_v47 = vpop.f32.mrb[11].mxu1 }
 0x10d   : > { %559 = vst [vmem:[%s1021_s17 + $0x48] sm:$0xff] %v458_v46  ;;  %575 = vst [vmem:[%s1021_s17 + $0xc8] sm:$0xff] %v1096_v47 }
 0x10f   : > { %585 = sbr.rel (%p801_p4) target bundleno = 278 (0x116), region = 32 }
 0x111   : > { %v1101_v48 = vpop.f32.mrb[12].mxu0  ;;  %v1103_v49 = vpop.f32.mrb[12].mxu1 }
 0x112   : > { %564 = vst [vmem:[%s1021_s17 + $0x70] sm:$0xff] %v1101_v48  ;;  %580 = vst [vmem:[%s1021_s17 + $0xf0] sm:$0xff] %v1103_v49  ;;  %v471_v50 = vpop.f32.mrb[13].mxu0  ;;  %v1109_v51 = vpop.f32.mrb[13].mxu1 }
 0x113   : > { %562 = vst [vmem:[%s1021_s17 + $0x60] sm:$0xff] %v471_v50  ;;  %578 = vst [vmem:[%s1021_s17 + $0xe0] sm:$0xff] %v1109_v51  ;;  %v859_v52 = vpop.f32.mrb[14].mxu0  ;;  %v1114_v53 = vpop.f32.mrb[14].mxu1 }
 0x114   : > { %565 = vst [vmem:[%s1021_s17 + $0x78] sm:$0xff] %v859_v52  ;;  %581 = vst [vmem:[%s1021_s17 + $0xf8] sm:$0xff] %v1114_v53  ;;  %v474_v54 = vpop.f32.mrb[15].mxu0  ;;  %v1119_v55 = vpop.f32.mrb[15].mxu1 }
 0x115   : > { %563 = vst [vmem:[%s1021_s17 + $0x68] sm:$0xff] %v474_v54  ;;  %579 = vst [vmem:[%s1021_s17 + $0xe8] sm:$0xff] %v1119_v55 }
 0x116 PF: > { %v589_v57 = vadd.f32 %v426_v30, %v1031_v26  ;;  %v629_v60 = vmul.f32 %v1031_v26, %v1031_v26  ;;  %v630_v61 = vmul.f32 %v426_v30, %v426_v30  ;;  %v631_v63 = vmul.f32 %v1023_v24, %v1023_v24 }
 0x117   : > { %v632_v1 = vmul.f32 %v1039_v28, %v1039_v28  ;;  %v633_v4 = vmul.f32 %v439_v34, %v439_v34  ;;  %v634_v7 = vmul.f32 %v442_v38, %v442_v38  ;;  %v635_v10 = vmul.f32 %v1052_v32, %v1052_v32 }
 0x118   : > { %v590_v58 = vadd.f32 %v1023_v24, %v589_v57  ;;  %v661_v2 = vadd.f32 %v630_v61, %v629_v60  ;;  %v636_v13 = vmul.f32 %v1065_v36, %v1065_v36  ;;  %v637_v16 = vmul.f32 %v455_v42, %v455_v42 }
 0x119   : > { %v638_v19 = vmul.f32 %v458_v46, %v458_v46  ;;  %v639_v22 = vmul.f32 %v1078_v40, %v1078_v40  ;;  %v640_v26 = vmul.f32 %v855_v44, %v855_v44  ;;  %v645_v60 = vmul.f32 %v1033_v27, %v1033_v27 }
 0x11a   : > { %v591_v59 = vadd.f32 %v1039_v28, %v590_v58  ;;  %v662_v5 = vadd.f32 %v661_v2, %v631_v63 }
 0x11c   : > { %v592_v62 = vadd.f32 %v591_v59, %v439_v34  ;;  %v663_v8 = vadd.f32 %v662_v5, %v632_v1  ;;  %v648_v1 = vmul.f32 %v1041_v29, %v1041_v29  ;;  %v650_v5 = vmul.f32 %v1073_v39, %v1073_v39 }
 0x11e   : > { %v593_v0 = vadd.f32 %v592_v62, %v442_v38  ;;  %v664_v11 = vadd.f32 %v663_v8, %v633_v4  ;;  %v642_v38 = vmul.f32 %v474_v54, %v474_v54 }
 0x120   : > { %v594_v3 = vadd.f32 %v1052_v32, %v593_v0  ;;  %v665_v14 = vadd.f32 %v664_v11, %v634_v7  ;;  %v641_v32 = vmul.f32 %v471_v50, %v471_v50  ;;  %v651_v7 = vmul.f32 %v1054_v33, %v1054_v33 }
 0x121   : > { %v653_v11 = vmul.f32 %v1086_v43, %v1086_v43 }
 0x122   : > { %v595_v6 = vadd.f32 %v1065_v36, %v594_v3  ;;  %v666_v17 = vadd.f32 %v665_v14, %v635_v10  ;;  %v649_v3 = vmul.f32 %v1060_v35, %v1060_v35 }
 0x124   : > { %v596_v9 = vadd.f32 %v595_v6, %v455_v42  ;;  %v667_v20 = vadd.f32 %v666_v17, %v636_v13  ;;  %v654_v13 = vmul.f32 %v1096_v47, %v1096_v47  ;;  %v656_v17 = vmul.f32 %v1091_v45, %v1091_v45 }
 0x126   : > { %v597_v12 = vadd.f32 %v596_v9, %v458_v46  ;;  %v668_v23 = vadd.f32 %v667_v20, %v637_v16  ;;  %v643_v46 = vmul.f32 %v1101_v48, %v1101_v48  ;;  %v652_v9 = vmul.f32 %v1067_v37, %v1067_v37 }
 0x128   : > { %v598_v15 = vadd.f32 %v1078_v40, %v597_v12  ;;  %v669_v28 = vadd.f32 %v668_v23, %v638_v19  ;;  %v644_v40 = vmul.f32 %v859_v52, %v859_v52  ;;  %v657_v19 = vmul.f32 %v1109_v51, %v1109_v51 }
 0x129   : > { %v659_v23 = vmul.f32 %v1103_v49, %v1103_v49 }
 0x12a   : > { %v599_v18 = vadd.f32 %v855_v44, %v598_v15  ;;  %v670_v34 = vadd.f32 %v669_v28, %v639_v22  ;;  %v655_v15 = vmul.f32 %v1080_v41, %v1080_v41 }
 0x12c   : > { %v600_v21 = vadd.f32 %v599_v18, %v471_v50  ;;  %v671_v56 = vadd.f32 %v670_v34, %v640_v26 }
 0x12e   : > { %v601_v24 = vadd.f32 %v600_v21, %v474_v54  ;;  %v672_v57 = vadd.f32 %v671_v56, %v641_v32  ;;  %v646_v54 = vmul.f32 %v1047_v31, %v1047_v31  ;;  %v658_v21 = vmul.f32 %v1119_v55, %v1119_v55 }
 0x130   : > { %v602_v30 = vadd.f32 %v1101_v48, %v601_v24  ;;  %v673_v59 = vadd.f32 %v672_v57, %v642_v38  ;;  %v647_v48 = vmul.f32 %v1025_v25, %v1025_v25 }
 0x132   : > { %v603_v36 = vadd.f32 %v859_v52, %v602_v30  ;;  %v674_v50 = vadd.f32 %v673_v59, %v643_v46 }
 0x134   : > { %v604_v42 = vadd.f32 %v603_v36, %v1033_v27  ;;  %v675_v62 = vadd.f32 %v674_v50, %v644_v40 }
 0x136   : > { %v605_v58 = vadd.f32 %v604_v42, %v1047_v31  ;;  %v676_v0 = vadd.f32 %v675_v62, %v645_v60 }
 0x138   : > { %v606_v44 = vadd.f32 %v1025_v25, %v605_v58  ;;  %v677_v2 = vadd.f32 %v676_v0, %v646_v54  ;;  %v628_v58 = vld [vmem:[%s1220_s4] sm:$0x1] }
 0x13a   : > { %v607_v61 = vadd.f32 %v1041_v29, %v606_v44  ;;  %v678_v4 = vadd.f32 %v677_v2, %v647_v48 }
 0x13c   : > { %v608_v63 = vadd.f32 %v607_v61, %v1060_v35  ;;  %v679_v6 = vadd.f32 %v678_v4, %v648_v1 }
 0x13e   : > { %v609_v52 = vadd.f32 %v608_v63, %v1073_v39  ;;  %v680_v8 = vadd.f32 %v679_v6, %v649_v3 }
 0x140   : > { %v610_v27 = vadd.f32 %v1054_v33, %v609_v52  ;;  %v681_v10 = vadd.f32 %v680_v8, %v650_v5 }
 0x142   : > { %v611_v31 = vadd.f32 %v1067_v37, %v610_v27  ;;  %v682_v12 = vadd.f32 %v681_v10, %v651_v7 }
 0x144   : > { %v612_v25 = vadd.f32 %v611_v31, %v1086_v43  ;;  %v683_v14 = vadd.f32 %v682_v12, %v652_v9 }
 0x146   : > { %v613_v29 = vadd.f32 %v612_v25, %v1096_v47  ;;  %v684_v16 = vadd.f32 %v683_v14, %v653_v11 }
 0x148   : > { %v614_v35 = vadd.f32 %v1080_v41, %v613_v29  ;;  %v685_v18 = vadd.f32 %v684_v16, %v654_v13 }
 0x14a   : > { %v615_v39 = vadd.f32 %v1091_v45, %v614_v35  ;;  %v686_v20 = vadd.f32 %v685_v18, %v655_v15  ;;  %v660_v45 = vmul.f32 %v1114_v53, %v1114_v53 }
 0x14c   : > { %v616_v33 = vadd.f32 %v615_v39, %v1109_v51  ;;  %v687_v22 = vadd.f32 %v686_v20, %v656_v17 }
 0x14e   : > { %v617_v37 = vadd.f32 %v616_v33, %v1119_v55  ;;  %v688_v24 = vadd.f32 %v687_v22, %v657_v19  ;;  %v588_v55 = vld [vmem:[%s1219_s3] sm:$0x1] }
 0x150   : > { %v618_v43 = vadd.f32 %v1103_v49, %v617_v37  ;;  %v689_v28 = vadd.f32 %v688_v24, %v658_v21 }
 0x152   : > { %v619_v47 = vadd.f32 %v1114_v53, %v618_v43  ;;  %v690_v32 = vadd.f32 %v689_v28, %v659_v23 }
 0x154   : > { %v620_v41 = vrot.slane %v619_v47, 4  ;;  %v691_v34 = vadd.f32 %v690_v32, %v660_v45 }
 0x156   : > { %v621_v26 = vadd.f32 %v620_v41, %v619_v47  ;;  %v692_v38 = vrot.slane %v691_v34, 4 }
 0x158   : > { %v622_v30 = vrot.slane %v621_v26, 2  ;;  %v693_v42 = vadd.f32 %v692_v38, %v691_v34 }
 0x15a   : > { %v623_v51 = vadd.f32 %v622_v30, %v621_v26  ;;  %v694_v49 = vrot.slane %v693_v42, 2 }
 0x15c   : > { %v624_v36 = vrot.slane %v623_v51, 1  ;;  %v695_v53 = vadd.f32 %v694_v49, %v693_v42 }
 0x15e   : > { %v625_v56 = vadd.f32 %v624_v36, %v623_v51  ;;  %v696_v57 = vrot.slane %v695_v53, 1 }
 0x160   : > { %v626_v46 = vadd.f32 %v625_v56, %v588_v55  ;;  %v697_v40 = vadd.f32 %v696_v57, %v695_v53 }
 0x162   : > { %627 = vst [vmem:[%s1219_s3] sm:$0x1] %v626_v46  ;;  %v698_v59 = vadd.f32 %v697_v40, %v628_v58 }
 0x164   : > { %699 = vst [vmem:[%s1220_s4] sm:$0x1] %v698_v59 }
 0x165 PF: > { %s15_s15 = sadd.s32 1, %s931_s15  }
 0x166   : > { %p12_p5 = scmp.ge.s32.totalorder %s15_s15, 4  }
 0x168   :  { %14 = sbr.rel (!%p12_p5) target bundleno = 1 (0x1), region = 78 }

// kernel: residual_block.7
= control target key start
LH: loop header
LB: loop body
LE: loop exit
PB: predicated region body
PF: predicated region fallthrough
CT: control target
= control target key end

     0   :  { %s1196_s15 = smov 0   ;;  %s1538_s0 = inlined_call_operand.vmem [shape: bf16[512,256], index: 0, kind: input, shape index: {}]   ;;  %s1539_s1 = inlined_call_operand.vmem [shape: bf16[256,128], index: 1, kind: input, shape index: {}]   ;;  %s1540_s2 = inlined_call_operand.vmem [shape: f32[512,128], index: 2, kind: output, shape index: {0}]   ;;  %s1541_s3 = inlined_call_operand.vmem [shape: f32[1,128], index: 3, kind: output, shape index: {1}]   ;;  %s1542_s4 = inlined_call_operand.vmem [shape: f32[1,128], index: 4, kind: output, shape index: {2}]  }
   0x1 LB: > { %s899_s16 = sadd.s32 4294967295, %s1168_s15   ;;  %p903_p0 = scmp.ge.s32.totalorder %s1168_s15, 1  ;;  %s1168_s15 = sphi %s1196_s15, %s15_s15  }
   0x2   : > { %p159_p1 = scmp.lt.s32.totalorder %s1168_s15, 3 }
   0x4   : > { %p160_p2 = pnand %p903_p0, %p159_p1 }
   0x5   : > { %v1098_v0 = vld [vmem:[%s1539_s1 + $0x40] sm:$0xff] (!%p160_p2)   ;;  %s904_s19 = sshll.u32 (!%p160_p2), %s899_s16, 5  ;;  %v1100_v2 = vld [vmem:[%s1539_s1 + $0x48] sm:$0xff] (!%p160_p2)   ;;  %v1102_v4 = vld [vmem:[%s1539_s1 + $0x50] sm:$0xff] (!%p160_p2)   ;;  %p957_p4 = scmp.ne.s32.totalorder (!%p160_p2), %s899_s16, 0 }
   0x6   : > { %163 = sbr.rel (%p160_p2) target bundleno = 391 (0x187), region = 28  ;;  %v1099_v1 = vld [vmem:[%s1539_s1] sm:$0xff] (!%p160_p2)   ;;  %961 = vmatprep.subr.bf16.mxu0 (!%p160_p2), %v1098_v0  ;;  %1073 = vmatprep.subr.bf16.mxu1 (!%p160_p2), %v1098_v0  ;;  %v1101_v3 = vld [vmem:[%s1539_s1 + $0x8] sm:$0xff] (!%p160_p2)   ;;  %p187_p3 = scmp.lt.s32.totalorder (!%p160_p2), %s904_s19, 63  ;;  %v1103_v5 = vld [vmem:[%s1539_s1 + $0x10] sm:$0xff] (!%p160_p2)  }
   0x7   : > { %962 = vmatpush3.bf16.msra.mxu0 (!%p160_p2), %v1099_v1  ;;  %1081 = vmatpush3.bf16.msra.mxu1 (!%p160_p2), %v1099_v1  ;;  %v1104_v6 = vld [vmem:[%s1539_s1 + $0x58] sm:$0xff] (!%p160_p2)   ;;  %v1106_v8 = vld [vmem:[%s1539_s1 + $0x60] sm:$0xff] (!%p160_p2)   ;;  %v1108_v10 = vld [vmem:[%s1539_s1 + $0x68] sm:$0xff] (!%p160_p2)  }
   0x8   : > { %963 = vmatprep.subr.bf16.mxu0 (!%p160_p2), %v1100_v2  ;;  %1074 = vmatprep.subr.bf16.mxu1 (!%p160_p2), %v1100_v2  ;;  %v1105_v7 = vld [vmem:[%s1539_s1 + $0x18] sm:$0xff] (!%p160_p2)   ;;  %v1107_v9 = vld [vmem:[%s1539_s1 + $0x20] sm:$0xff] (!%p160_p2)   ;;  %v1109_v13 = vld [vmem:[%s1539_s1 + $0x28] sm:$0xff] (!%p160_p2)  }
   0x9   : > { %v1110_v14 = vld [vmem:[%s1539_s1 + $0x70] sm:$0xff] (!%p160_p2)   ;;  %v1112_v16 = vld [vmem:[%s1539_s1 + $0x78] sm:$0xff] (!%p160_p2)  }
   0xa   : > { %v1111_v15 = vld [vmem:[%s1539_s1 + $0x30] sm:$0xff] (!%p160_p2)   ;;  %v1113_v17 = vld [vmem:[%s1539_s1 + $0x38] sm:$0xff] (!%p160_p2)  }
   0xb   : > { %964 = vmatpush3.bf16.msra.mxu0 (!%p160_p2), %v1101_v3  ;;  %1082 = vmatpush3.bf16.msra.mxu1 (!%p160_p2), %v1101_v3 }
   0xc   : > { %965 = vmatprep.subr.bf16.mxu0 (!%p160_p2), %v1102_v4  ;;  %1075 = vmatprep.subr.bf16.mxu1 (!%p160_p2), %v1102_v4 }
   0xd   : > { %s1544_s19 = smov (!%p187_p3, %s904_s19), 63 }
   0xe   : > { %s960_s8 = sshll.u32 %s1544_s19, 3 }
   0xf   : > { %966 = vmatpush3.bf16.msra.mxu0 %v1103_v5  ;;  %1083 = vmatpush3.bf16.msra.mxu1 %v1103_v5  ;;  %s1241_s13 = scalar_lea.vmem %s1538_s0, %s960_s8  ;;  %s1301_s7 = scalar_lea.vmem %s1540_s2, %s960_s8 }
  0x10   : > { %967 = vmatprep.subr.bf16.mxu0 %v1104_v6  ;;  %1076 = vmatprep.subr.bf16.mxu1 %v1104_v6  ;;  %v1116_v11 = vld [vmem:[%s1241_s13 + $0x4] ss:$8 sps:$4 sm:$0xff]   ;;  %v1114_v18 = vld [vmem:[%s1241_s13] ss:$8 sps:$4 sm:$0xff]   ;;  %v1120_v20 = vld [vmem:[%s1241_s13 + $0x14] ss:$8 sps:$4 sm:$0xff]  }
  0x11   : > { %v1119_v12 = vld [vmem:[%s1241_s13 + $0x84] ss:$8 sps:$4 sm:$0xff]   ;;  %552 = vmatprep.mubr.bf16.mxu0 %v1116_v11  ;;  %v1117_v19 = vld [vmem:[%s1241_s13 + $0x80] ss:$8 sps:$4 sm:$0xff]   ;;  %v1122_v21 = vld [vmem:[%s1241_s13 + $0x94] ss:$8 sps:$4 sm:$0xff]  }
  0x12   : > { %616 = vmatprep.mubr.bf16.mxu1 %v1119_v12  ;;  %v1124_v22 = vld [vmem:[%s1241_s13 + $0x10] ss:$8 sps:$4 sm:$0xff]   ;;  %v1126_v24 = vld [vmem:[%s1241_s13 + $0x24] ss:$8 sps:$4 sm:$0xff]   ;;  %v1130_v26 = vld [vmem:[%s1241_s13 + $0x20] ss:$8 sps:$4 sm:$0xff]  }
  0x13   : > { %968 = vmatpush3.bf16.msra.mxu0 %v1105_v7  ;;  %1084 = vmatpush3.bf16.msra.mxu1 %v1105_v7  ;;  %v1125_v23 = vld [vmem:[%s1241_s13 + $0x90] ss:$8 sps:$4 sm:$0xff]   ;;  %v1128_v25 = vld [vmem:[%s1241_s13 + $0xa4] ss:$8 sps:$4 sm:$0xff]   ;;  %v1131_v27 = vld [vmem:[%s1241_s13 + $0xa0] ss:$8 sps:$4 sm:$0xff]  }
  0x14   : > { %969 = vmatprep.subr.bf16.mxu0 %v1106_v8  ;;  %1077 = vmatprep.subr.bf16.mxu1 %v1106_v8  ;;  %v1132_v28 = vld [vmem:[%s1241_s13 + $0x34] ss:$8 sps:$4 sm:$0xff]   ;;  %v1136_v30 = vld [vmem:[%s1241_s13 + $0x30] ss:$8 sps:$4 sm:$0xff]   ;;  %v1138_v32 = vld [vmem:[%s1241_s13 + $0x44] ss:$8 sps:$4 sm:$0xff]  }
  0x15   : > { %v1134_v29 = vld [vmem:[%s1241_s13 + $0xb4] ss:$8 sps:$4 sm:$0xff]   ;;  %v1137_v31 = vld [vmem:[%s1241_s13 + $0xb0] ss:$8 sps:$4 sm:$0xff]   ;;  %v1140_v33 = vld [vmem:[%s1241_s13 + $0xc4] ss:$8 sps:$4 sm:$0xff]  }
  0x16   : > { %v1142_v34 = vld [vmem:[%s1241_s13 + $0x40] ss:$8 sps:$4 sm:$0xff]   ;;  %v1144_v36 = vld [vmem:[%s1241_s13 + $0x54] ss:$8 sps:$4 sm:$0xff]   ;;  %v1148_v38 = vld [vmem:[%s1241_s13 + $0x50] ss:$8 sps:$4 sm:$0xff]  }
  0x17   : > { %970 = vmatpush3.bf16.msra.mxu0 %v1107_v9  ;;  %1085 = vmatpush3.bf16.msra.mxu1 %v1107_v9  ;;  %v1143_v35 = vld [vmem:[%s1241_s13 + $0xc0] ss:$8 sps:$4 sm:$0xff]   ;;  %v1146_v37 = vld [vmem:[%s1241_s13 + $0xd4] ss:$8 sps:$4 sm:$0xff]   ;;  %v1149_v39 = vld [vmem:[%s1241_s13 + $0xd0] ss:$8 sps:$4 sm:$0xff]  }
  0x18   : > { %971 = vmatprep.subr.bf16.mxu0 %v1108_v10  ;;  %1078 = vmatprep.subr.bf16.mxu1 %v1108_v10  ;;  %v1150_v40 = vld [vmem:[%s1241_s13 + $0x64] ss:$8 sps:$4 sm:$0xff]   ;;  %v1154_v42 = vld [vmem:[%s1241_s13 + $0x60] ss:$8 sps:$4 sm:$0xff]   ;;  %v1156_v44 = vld [vmem:[%s1241_s13 + $0x74] ss:$8 sps:$4 sm:$0xff]  }
  0x19   : > { %v1152_v41 = vld [vmem:[%s1241_s13 + $0xe4] ss:$8 sps:$4 sm:$0xff]   ;;  %v1155_v43 = vld [vmem:[%s1241_s13 + $0xe0] ss:$8 sps:$4 sm:$0xff]   ;;  %v1158_v45 = vld [vmem:[%s1241_s13 + $0xf4] ss:$8 sps:$4 sm:$0xff]  }
  0x1a   : > { %v1160_v46 = vld [vmem:[%s1241_s13 + $0x70] ss:$8 sps:$4 sm:$0xff]  }
  0x1b   : > { %972 = vmatpush3.bf16.msra.mxu0 %v1109_v13  ;;  %1086 = vmatpush3.bf16.msra.mxu1 %v1109_v13  ;;  %v1161_v47 = vld [vmem:[%s1241_s13 + $0xf0] ss:$8 sps:$4 sm:$0xff]  }
  0x1c   : > { %973 = vmatprep.subr.bf16.mxu0 %v1110_v14  ;;  %1079 = vmatprep.subr.bf16.mxu1 %v1110_v14 }
  0x1f   : > { %974 = vmatpush3.bf16.msra.mxu0 %v1111_v15  ;;  %1087 = vmatpush3.bf16.msra.mxu1 %v1111_v15 }
  0x20   : > { %975 = vmatprep.subr.bf16.mxu0 %v1112_v16  ;;  %1080 = vmatprep.subr.bf16.mxu1 %v1112_v16 }
  0x23   : > { %976 = vmatpush3.bf16.msra.mxu0 %v1113_v17  ;;  %1088 = vmatpush3.bf16.msra.mxu1 %v1113_v17 }
  0x26   : > { %553 = vmatmul.mubr.bf16.vlgmr.msra.gmra.mrb[0].mxu0 %v1114_v18  ;;  %617 = vmatmul.mubr.bf16.vlgmr.msra.gmra.mrb[0].mxu1 %v1117_v19 }
  0x27   : > { %560 = vmatprep.mubr.bf16.mxu0 %v1120_v20  ;;  %624 = vmatprep.mubr.bf16.mxu1 %v1122_v21 }
  0x2e   : > { %561 = vmatmul.mubr.bf16.gmra.mrb[4].mxu0 %v1124_v22  ;;  %625 = vmatmul.mubr.bf16.gmra.mrb[4].mxu1 %v1125_v23 }
  0x2f   : > { %568 = vmatprep.mubr.bf16.mxu0 %v1126_v24  ;;  %632 = vmatprep.mubr.bf16.mxu1 %v1128_v25 }
  0x36   : > { %569 = vmatmul.mubr.bf16.gmra.mrb[8].mxu0 %v1130_v26  ;;  %633 = vmatmul.mubr.bf16.gmra.mrb[8].mxu1 %v1131_v27 }
  0x37   : > { %576 = vmatprep.mubr.bf16.mxu0 %v1132_v28  ;;  %640 = vmatprep.mubr.bf16.mxu1 %v1134_v29 }
  0x3e   : > { %577 = vmatmul.mubr.bf16.gmra.mrb[12].mxu0 %v1136_v30  ;;  %641 = vmatmul.mubr.bf16.gmra.mrb[12].mxu1 %v1137_v31 }
  0x3f   : > { %584 = vmatprep.mubr.bf16.mxu0 %v1138_v32  ;;  %648 = vmatprep.mubr.bf16.mxu1 %v1140_v33 }
  0x46   : > { %585 = vmatmul.mubr.bf16.gmra.mrb[16].mxu0 %v1142_v34  ;;  %649 = vmatmul.mubr.bf16.gmra.mrb[16].mxu1 %v1143_v35 }
  0x47   : > { %592 = vmatprep.mubr.bf16.mxu0 %v1144_v36  ;;  %656 = vmatprep.mubr.bf16.mxu1 %v1146_v37 }
  0x4e   : > { %593 = vmatmul.mubr.bf16.gmra.mrb[20].mxu0 %v1148_v38  ;;  %657 = vmatmul.mubr.bf16.gmra.mrb[20].mxu1 %v1149_v39 }
  0x4f   : > { %600 = vmatprep.mubr.bf16.mxu0 %v1150_v40  ;;  %664 = vmatprep.mubr.bf16.mxu1 %v1152_v41 }
  0x56   : > { %601 = vmatmul.mubr.bf16.gmra.mrb[24].mxu0 %v1154_v42  ;;  %665 = vmatmul.mubr.bf16.gmra.mrb[24].mxu1 %v1155_v43 }
  0x57   : > { %608 = vmatprep.mubr.bf16.mxu0 %v1156_v44  ;;  %672 = vmatprep.mubr.bf16.mxu1 %v1158_v45 }
  0x5e   : > { %609 = vmatmul.mubr.bf16.gmra.mrb[28].mxu0 %v1160_v46  ;;  %673 = vmatmul.mubr.bf16.gmra.mrb[28].mxu1 %v1161_v47 }
  0xf9   : > { %v977_v48 = vpop.f32.mrb[0].mxu0  ;;  %v1025_v49 = vpop.f32.mrb[0].mxu1 }
  0xfa   : > { %v978_v50 = vpop.f32.mrb[1].mxu0  ;;  %v1026_v51 = vpop.f32.mrb[1].mxu1 }
  0xfb   : > { %v1303_v52 = vadd.f32 %v978_v50, %v977_v48  ;;  %v1305_v53 = vadd.f32 %v1026_v51, %v1025_v49  ;;  %v980_v54 = vpop.f32.mrb[2].mxu0  ;;  %v1028_v55 = vpop.f32.mrb[2].mxu1 }
  0xfc   : > { %v981_v56 = vpop.f32.mrb[3].mxu0  ;;  %v1029_v57 = vpop.f32.mrb[3].mxu1 }
  0xfd   : > { %681 = vst [vmem:[%s1301_s7] sm:$0xff] %v1303_v52  ;;  %697 = vst [vmem:[%s1301_s7 + $0x80] sm:$0xff] %v1305_v53  ;;  %v1311_v58 = vadd.f32 %v981_v56, %v980_v54  ;;  %v1313_v59 = vadd.f32 %v1029_v57, %v1028_v55 }
  0xff   : > { %682 = vst [vmem:[%s1301_s7 + $0x8] sm:$0xff] %v1311_v58  ;;  %698 = vst [vmem:[%s1301_s7 + $0x88] sm:$0xff] %v1313_v59 }
 0x101   : > { %v983_v60 = vpop.f32.mrb[4].mxu0  ;;  %v1031_v61 = vpop.f32.mrb[4].mxu1 }
 0x102   : > { %v984_v62 = vpop.f32.mrb[5].mxu0  ;;  %v1032_v63 = vpop.f32.mrb[5].mxu1 }
 0x103   : > { %v1319_v0 = vadd.f32 %v984_v62, %v983_v60  ;;  %v1321_v1 = vadd.f32 %v1032_v63, %v1031_v61  ;;  %v986_v2 = vpop.f32.mrb[6].mxu0  ;;  %v1034_v3 = vpop.f32.mrb[6].mxu1 }
 0x104   : > { %v987_v4 = vpop.f32.mrb[7].mxu0  ;;  %v1035_v5 = vpop.f32.mrb[7].mxu1 }
 0x105   : > { %683 = vst [vmem:[%s1301_s7 + $0x10] sm:$0xff] %v1319_v0  ;;  %699 = vst [vmem:[%s1301_s7 + $0x90] sm:$0xff] %v1321_v1  ;;  %v1327_v6 = vadd.f32 %v987_v4, %v986_v2  ;;  %v1329_v7 = vadd.f32 %v1035_v5, %v1034_v3 }
 0x107   : > { %684 = vst [vmem:[%s1301_s7 + $0x18] sm:$0xff] %v1327_v6  ;;  %700 = vst [vmem:[%s1301_s7 + $0x98] sm:$0xff] %v1329_v7 }
 0x109   : > { %v989_v8 = vpop.f32.mrb[8].mxu0  ;;  %v1037_v9 = vpop.f32.mrb[8].mxu1 }
 0x10a   : > { %v990_v10 = vpop.f32.mrb[9].mxu0  ;;  %v1038_v11 = vpop.f32.mrb[9].mxu1 }
 0x10b   : > { %v1335_v12 = vadd.f32 %v990_v10, %v989_v8  ;;  %v1337_v13 = vadd.f32 %v1038_v11, %v1037_v9  ;;  %v992_v14 = vpop.f32.mrb[10].mxu0  ;;  %v1040_v15 = vpop.f32.mrb[10].mxu1 }
 0x10c   : > { %v993_v16 = vpop.f32.mrb[11].mxu0  ;;  %v1041_v17 = vpop.f32.mrb[11].mxu1 }
 0x10d   : > { %685 = vst [vmem:[%s1301_s7 + $0x20] sm:$0xff] %v1335_v12  ;;  %701 = vst [vmem:[%s1301_s7 + $0xa0] sm:$0xff] %v1337_v13  ;;  %v1343_v18 = vadd.f32 %v993_v16, %v992_v14  ;;  %v1345_v19 = vadd.f32 %v1041_v17, %v1040_v15 }
 0x10f   : > { %686 = vst [vmem:[%s1301_s7 + $0x28] sm:$0xff] %v1343_v18  ;;  %702 = vst [vmem:[%s1301_s7 + $0xa8] sm:$0xff] %v1345_v19 }
 0x111   : > { %v995_v20 = vpop.f32.mrb[12].mxu0  ;;  %v1043_v21 = vpop.f32.mrb[12].mxu1 }
 0x112   : > { %v996_v22 = vpop.f32.mrb[13].mxu0  ;;  %v1044_v23 = vpop.f32.mrb[13].mxu1 }
 0x113   : > { %v1351_v24 = vadd.f32 %v996_v22, %v995_v20  ;;  %v1353_v25 = vadd.f32 %v1044_v23, %v1043_v21  ;;  %v998_v26 = vpop.f32.mrb[14].mxu0  ;;  %v1046_v27 = vpop.f32.mrb[14].mxu1 }
 0x114   : > { %v999_v28 = vpop.f32.mrb[15].mxu0  ;;  %v1047_v29 = vpop.f32.mrb[15].mxu1 }
 0x115   : > { %687 = vst [vmem:[%s1301_s7 + $0x30] sm:$0xff] %v1351_v24  ;;  %703 = vst [vmem:[%s1301_s7 + $0xb0] sm:$0xff] %v1353_v25  ;;  %v1359_v30 = vadd.f32 %v999_v28, %v998_v26  ;;  %v1361_v31 = vadd.f32 %v1047_v29, %v1046_v27 }
 0x117   : > { %688 = vst [vmem:[%s1301_s7 + $0x38] sm:$0xff] %v1359_v30  ;;  %704 = vst [vmem:[%s1301_s7 + $0xb8] sm:$0xff] %v1361_v31 }
 0x119   : > { %v1001_v32 = vpop.f32.mrb[16].mxu0  ;;  %v1049_v33 = vpop.f32.mrb[16].mxu1 }
 0x11a   : > { %v1002_v34 = vpop.f32.mrb[17].mxu0  ;;  %v1050_v35 = vpop.f32.mrb[17].mxu1 }
 0x11b   : > { %v1367_v36 = vadd.f32 %v1002_v34, %v1001_v32  ;;  %v1369_v37 = vadd.f32 %v1050_v35, %v1049_v33  ;;  %v1004_v38 = vpop.f32.mrb[18].mxu0  ;;  %v1052_v39 = vpop.f32.mrb[18].mxu1  ;;  %v1170_v32 = vmov (!%p957_p4), 0.0  }
 0x11c   : > { %v1005_v40 = vpop.f32.mrb[19].mxu0  ;;  %v1053_v41 = vpop.f32.mrb[19].mxu1  ;;  %717 = vst [vmem:[%s1541_s3] sm:$0x1] (!%p957_p4), %v1170_v32  ;;  %718 = vst [vmem:[%s1542_s4] sm:$0x1] (!%p957_p4), %v1170_v32 }
 0x11d   : > { %689 = vst [vmem:[%s1301_s7 + $0x40] sm:$0xff] %v1367_v36  ;;  %705 = vst [vmem:[%s1301_s7 + $0xc0] sm:$0xff] %v1369_v37  ;;  %v1375_v42 = vadd.f32 %v1005_v40, %v1004_v38  ;;  %v1377_v43 = vadd.f32 %v1053_v41, %v1052_v39 }
 0x11f   : > { %690 = vst [vmem:[%s1301_s7 + $0x48] sm:$0xff] %v1375_v42  ;;  %706 = vst [vmem:[%s1301_s7 + $0xc8] sm:$0xff] %v1377_v43 }
 0x121   : > { %v1007_v44 = vpop.f32.mrb[20].mxu0  ;;  %v1055_v45 = vpop.f32.mrb[20].mxu1 }
 0x122   : > { %v1008_v46 = vpop.f32.mrb[21].mxu0  ;;  %v1056_v47 = vpop.f32.mrb[21].mxu1 }
 0x123   : > { %v1383_v48 = vadd.f32 %v1008_v46, %v1007_v44  ;;  %v1385_v49 = vadd.f32 %v1056_v47, %v1055_v45  ;;  %v1010_v50 = vpop.f32.mrb[22].mxu0  ;;  %v1058_v51 = vpop.f32.mrb[22].mxu1 }
 0x124   : > { %v1011_v54 = vpop.f32.mrb[23].mxu0  ;;  %v1059_v55 = vpop.f32.mrb[23].mxu1 }
 0x125   : > { %691 = vst [vmem:[%s1301_s7 + $0x50] sm:$0xff] %v1383_v48  ;;  %707 = vst [vmem:[%s1301_s7 + $0xd0] sm:$0xff] %v1385_v49  ;;  %v1391_v56 = vadd.f32 %v1011_v54, %v1010_v50  ;;  %v1393_v57 = vadd.f32 %v1059_v55, %v1058_v51 }
 0x127   : > { %692 = vst [vmem:[%s1301_s7 + $0x58] sm:$0xff] %v1391_v56  ;;  %708 = vst [vmem:[%s1301_s7 + $0xd8] sm:$0xff] %v1393_v57 }
 0x129   : > { %v1013_v60 = vpop.f32.mrb[24].mxu0  ;;  %v1061_v61 = vpop.f32.mrb[24].mxu1 }
 0x12a   : > { %v1014_v62 = vpop.f32.mrb[25].mxu0  ;;  %v1062_v63 = vpop.f32.mrb[25].mxu1 }
 0x12b   : > { %v1399_v2 = vadd.f32 %v1014_v62, %v1013_v60  ;;  %v1401_v3 = vadd.f32 %v1062_v63, %v1061_v61  ;;  %v1016_v4 = vpop.f32.mrb[26].mxu0  ;;  %v1064_v5 = vpop.f32.mrb[26].mxu1 }
 0x12c   : > { %v1017_v8 = vpop.f32.mrb[27].mxu0  ;;  %v1065_v9 = vpop.f32.mrb[27].mxu1 }
 0x12d   : > { %693 = vst [vmem:[%s1301_s7 + $0x60] sm:$0xff] %v1399_v2  ;;  %709 = vst [vmem:[%s1301_s7 + $0xe0] sm:$0xff] %v1401_v3  ;;  %v1407_v10 = vadd.f32 %v1017_v8, %v1016_v4  ;;  %v1409_v11 = vadd.f32 %v1065_v9, %v1064_v5 }
 0x12f   : > { %694 = vst [vmem:[%s1301_s7 + $0x68] sm:$0xff] %v1407_v10  ;;  %710 = vst [vmem:[%s1301_s7 + $0xe8] sm:$0xff] %v1409_v11 }
 0x131   : > { %v1019_v14 = vpop.f32.mrb[28].mxu0  ;;  %v1067_v15 = vpop.f32.mrb[28].mxu1  ;;  %716 = sbr.rel (%p957_p4) target bundleno = 312 (0x138), region = 32 }
 0x132   : > { %v1020_v16 = vpop.f32.mrb[29].mxu0  ;;  %v1068_v17 = vpop.f32.mrb[29].mxu1 }
 0x133   : > { %v1021_v20 = vadd.f32 %v1020_v16, %v1019_v14  ;;  %v1415_v21 = vadd.f32 %v1068_v17, %v1067_v15  ;;  %v1022_v22 = vpop.f32.mrb[30].mxu0  ;;  %v1070_v23 = vpop.f32.mrb[30].mxu1 }
 0x134   : > { %v1023_v26 = vpop.f32.mrb[31].mxu0  ;;  %v1071_v27 = vpop.f32.mrb[31].mxu1 }
 0x135   : > { %695 = vst [vmem:[%s1301_s7 + $0x70] sm:$0xff] %v1021_v20  ;;  %711 = vst [vmem:[%s1301_s7 + $0xf0] sm:$0xff] %v1415_v21  ;;  %v1024_v28 = vadd.f32 %v1023_v26, %v1022_v22  ;;  %v1420_v29 = vadd.f32 %v1071_v27, %v1070_v23 }
 0x137   : > { %696 = vst [vmem:[%s1301_s7 + $0x78] sm:$0xff] %v1024_v28  ;;  %712 = vst [vmem:[%s1301_s7 + $0xf8] sm:$0xff] %v1420_v29 }
 0x138 PF: > { %v720_v33 = vadd.f32 %v1311_v58, %v1303_v52  ;;  %v760_v38 = vmul.f32 %v1303_v52, %v1303_v52  ;;  %v761_v39 = vmul.f32 %v1311_v58, %v1311_v58  ;;  %v762_v41 = vmul.f32 %v1319_v0, %v1319_v0 }
 0x139   : > { %v763_v45 = vmul.f32 %v1327_v6, %v1327_v6  ;;  %v764_v50 = vmul.f32 %v1335_v12, %v1335_v12  ;;  %v765_v58 = vmul.f32 %v1343_v18, %v1343_v18  ;;  %v766_v55 = vmul.f32 %v1351_v24, %v1351_v24 }
 0x13a   : > { %v721_v34 = vadd.f32 %v1319_v0, %v720_v33  ;;  %v792_v46 = vadd.f32 %v761_v39, %v760_v38  ;;  %v767_v61 = vmul.f32 %v1359_v30, %v1359_v30  ;;  %v768_v63 = vmul.f32 %v1367_v36, %v1367_v36 }
 0x13b   : > { %v769_v5 = vmul.f32 %v1375_v42, %v1375_v42  ;;  %v770_v9 = vmul.f32 %v1383_v48, %v1383_v48  ;;  %v771_v15 = vmul.f32 %v1391_v56, %v1391_v56  ;;  %v772_v17 = vmul.f32 %v1399_v2, %v1399_v2 }
 0x13c   : > { %v722_v35 = vadd.f32 %v1327_v6, %v721_v34  ;;  %v793_v52 = vadd.f32 %v792_v46, %v762_v41  ;;  %v775_v34 = vmul.f32 %v1024_v28, %v1024_v28  ;;  %v776_v38 = vmul.f32 %v1305_v53, %v1305_v53 }
 0x13e   : > { %v723_v40 = vadd.f32 %v1335_v12, %v722_v35  ;;  %v794_v54 = vadd.f32 %v793_v52, %v763_v45  ;;  %v779_v45 = vmul.f32 %v1329_v7, %v1329_v7  ;;  %v781_v52 = vmul.f32 %v1345_v19, %v1345_v19 }
 0x140   : > { %v724_v44 = vadd.f32 %v1343_v18, %v723_v40  ;;  %v795_v60 = vadd.f32 %v794_v54, %v764_v50 }
 0x142   : > { %v725_v47 = vadd.f32 %v1351_v24, %v724_v44  ;;  %v796_v62 = vadd.f32 %v795_v60, %v765_v58  ;;  %v782_v58 = vmul.f32 %v1353_v25, %v1353_v25  ;;  %v784_v60 = vmul.f32 %v1369_v37, %v1369_v37 }
 0x144   : > { %v726_v51 = vadd.f32 %v1359_v30, %v725_v47  ;;  %v797_v4 = vadd.f32 %v796_v62, %v766_v55  ;;  %v780_v47 = vmul.f32 %v1337_v13, %v1337_v13 }
 0x146   : > { %v727_v0 = vadd.f32 %v1367_v36, %v726_v51  ;;  %v798_v8 = vadd.f32 %v797_v4, %v767_v61  ;;  %v785_v61 = vmul.f32 %v1377_v43, %v1377_v43  ;;  %v787_v4 = vmul.f32 %v1393_v57, %v1393_v57 }
 0x148   : > { %v728_v6 = vadd.f32 %v1375_v42, %v727_v0  ;;  %v799_v14 = vadd.f32 %v798_v8, %v768_v63  ;;  %v773_v42 = vmul.f32 %v1407_v10, %v1407_v10  ;;  %v783_v0 = vmul.f32 %v1361_v31, %v1361_v31 }
 0x14a   : > { %v729_v12 = vadd.f32 %v1383_v48, %v728_v6  ;;  %v800_v16 = vadd.f32 %v799_v14, %v769_v5  ;;  %v774_v48 = vmul.f32 %v1021_v20, %v1021_v20  ;;  %v788_v5 = vmul.f32 %v1401_v3, %v1401_v3 }
 0x14b   : > { %v790_v14 = vmul.f32 %v1415_v21, %v1415_v21 }
 0x14c   : > { %v730_v18 = vadd.f32 %v1391_v56, %v729_v12  ;;  %v801_v22 = vadd.f32 %v800_v16, %v770_v9  ;;  %v786_v12 = vmul.f32 %v1385_v49, %v1385_v49 }
 0x14e   : > { %v731_v24 = vadd.f32 %v1399_v2, %v730_v18  ;;  %v802_v26 = vadd.f32 %v801_v22, %v771_v15 }
 0x150   : > { %v732_v30 = vadd.f32 %v1407_v10, %v731_v24  ;;  %v803_v32 = vadd.f32 %v802_v26, %v772_v17  ;;  %v777_v10 = vmul.f32 %v1313_v59, %v1313_v59  ;;  %v789_v24 = vmul.f32 %v1409_v11, %v1409_v11 }
 0x152   : > { %v733_v36 = vadd.f32 %v1021_v20, %v732_v30  ;;  %v804_v35 = vadd.f32 %v803_v32, %v773_v42  ;;  %v778_v20 = vmul.f32 %v1321_v1, %v1321_v1 }
 0x154   : > { %v734_v23 = vadd.f32 %v1024_v28, %v733_v36  ;;  %v805_v2 = vadd.f32 %v804_v35, %v774_v48 }
 0x156   : > { %v735_v27 = vadd.f32 %v1305_v53, %v734_v23  ;;  %v806_v40 = vadd.f32 %v805_v2, %v775_v34 }
 0x158   : > { %v736_v33 = vadd.f32 %v1313_v59, %v735_v27  ;;  %v807_v44 = vadd.f32 %v806_v40, %v776_v38 }
 0x15a   : > { %v737_v56 = vadd.f32 %v1321_v1, %v736_v33  ;;  %v808_v46 = vadd.f32 %v807_v44, %v777_v10  ;;  %v759_v33 = vld [vmem:[%s1542_s4] sm:$0x1] }
 0x15c   : > { %v738_v39 = vadd.f32 %v1329_v7, %v737_v56  ;;  %v809_v50 = vadd.f32 %v808_v46, %v778_v20 }
 0x15e   : > { %v739_v41 = vadd.f32 %v1337_v13, %v738_v39  ;;  %v810_v51 = vadd.f32 %v809_v50, %v779_v45 }
 0x160   : > { %v740_v28 = vadd.f32 %v1345_v19, %v739_v41  ;;  %v811_v54 = vadd.f32 %v810_v51, %v780_v47 }
 0x162   : > { %v741_v53 = vadd.f32 %v1353_v25, %v740_v28  ;;  %v812_v55 = vadd.f32 %v811_v54, %v781_v52 }
 0x164   : > { %v742_v59 = vadd.f32 %v1361_v31, %v741_v53  ;;  %v813_v6 = vadd.f32 %v812_v55, %v782_v58 }
 0x166   : > { %v743_v1 = vadd.f32 %v1369_v37, %v742_v59  ;;  %v814_v62 = vadd.f32 %v813_v6, %v783_v0 }
 0x168   : > { %v744_v7 = vadd.f32 %v1377_v43, %v743_v1  ;;  %v815_v63 = vadd.f32 %v814_v62, %v784_v60 }
 0x16a   : > { %v745_v13 = vadd.f32 %v1385_v49, %v744_v7  ;;  %v816_v18 = vadd.f32 %v815_v63, %v785_v61 }
 0x16c   : > { %v746_v19 = vadd.f32 %v1393_v57, %v745_v13  ;;  %v817_v8 = vadd.f32 %v816_v18, %v786_v12  ;;  %v791_v57 = vmul.f32 %v1420_v29, %v1420_v29 }
 0x16e   : > { %v747_v25 = vadd.f32 %v1401_v3, %v746_v19  ;;  %v818_v9 = vadd.f32 %v817_v8, %v787_v4 }
 0x170   : > { %v748_v31 = vadd.f32 %v1409_v11, %v747_v25  ;;  %v819_v30 = vadd.f32 %v818_v9, %v788_v5  ;;  %v719_v11 = vld [vmem:[%s1541_s3] sm:$0x1] }
 0x172   : > { %v749_v37 = vadd.f32 %v1415_v21, %v748_v31  ;;  %v820_v16 = vadd.f32 %v819_v30, %v789_v24 }
 0x174   : > { %v750_v43 = vadd.f32 %v1420_v29, %v749_v37  ;;  %v821_v17 = vadd.f32 %v820_v16, %v790_v14 }
 0x176   : > { %v751_v49 = vrot.slane %v750_v43, 4  ;;  %v822_v22 = vadd.f32 %v821_v17, %v791_v57 }
 0x178   : > { %v752_v15 = vadd.f32 %v751_v49, %v750_v43  ;;  %v823_v42 = vrot.slane %v822_v22, 4 }
 0x17a   : > { %v753_v36 = vrot.slane %v752_v15, 2  ;;  %v824_v27 = vadd.f32 %v823_v42, %v822_v22 }
 0x17c   : > { %v754_v3 = vadd.f32 %v753_v36, %v752_v15  ;;  %v825_v21 = vrot.slane %v824_v27, 2 }
 0x17e   : > { %v755_v23 = vrot.slane %v754_v3, 1  ;;  %v826_v29 = vadd.f32 %v825_v21, %v824_v27 }
 0x180   : > { %v756_v26 = vadd.f32 %v755_v23, %v754_v3  ;;  %v827_v32 = vrot.slane %v826_v29, 1 }
 0x182   : > { %v757_v48 = vadd.f32 %v756_v26, %v719_v11  ;;  %v828_v34 = vadd.f32 %v827_v32, %v826_v29 }
 0x184   : > { %758 = vst [vmem:[%s1541_s3] sm:$0x1] %v757_v48  ;;  %v829_v35 = vadd.f32 %v828_v34, %v759_v33 }
 0x186   : > { %830 = vst [vmem:[%s1542_s4] sm:$0x1] %v829_v35 }
 0x187 PF: > { %s15_s15 = sadd.s32 1, %s1168_s15  }
 0x188   : > { %p12_p5 = scmp.ge.s32.totalorder %s15_s15, 4  }
 0x18a   :  { %14 = sbr.rel (!%p12_p5) target bundleno = 1 (0x1), region = 78 }

// kernel: residual_block.9
= control target key start
LH: loop header
LB: loop body
LE: loop exit
PB: predicated region body
PF: predicated region fallthrough
CT: control target
= control target key end

     0   :  { %s729_s21 = smov 0   ;;  %s1004_s0 = inlined_call_operand.vmem [shape: f32[512,128], index: 0, kind: input, shape index: {}]   ;;  %s1005_s1 = inlined_call_operand.vmem [shape: f32[512,128], index: 1, kind: input, shape index: {}]   ;;  %s1006_s2 = inlined_call_operand.vmem [shape: f32[1,128], index: 2, kind: input, shape index: {}]   ;;  %s1007_s3 = inlined_call_operand.vmem [shape: f32[1,128], index: 3, kind: input, shape index: {}]   ;;  %s1008_s4 = inlined_call_operand.vmem [shape: f32[1,128], index: 4, kind: input, shape index: {}]   ;;  %s1009_s5 = inlined_call_operand.vmem [shape: f32[1,128], index: 5, kind: input, shape index: {}]   ;;  %s1010_s6 = inlined_call_operand.vmem [shape: f32[512,128], index: 6, kind: output, shape index: {}]  }
   0x1 LB: > { %s661_s22 = sadd.s32 4294967295, %s692_s21   ;;  %p665_p0 = scmp.ge.s32.totalorder %s692_s21, 1  ;;  %s692_s21 = sphi %s729_s21, %s16_s21  }
   0x2   : > { %p224_p1 = scmp.lt.s32.totalorder %s692_s21, 3 }
   0x4   : > { %p225_p2 = pnand %p665_p0, %p224_p1 }
   0x5   : > { %s666_s23 = sshll.u32 (!%p225_p2), %s661_s22, 5  ;;  %v742_v0 = vld [vmem:[%s1006_s2] ss:$0 sm:$0xff] (!%p225_p2) }
   0x6   : > { %228 = sbr.rel (%p225_p2) target bundleno = 72 (0x48), region = 44  ;;  %p260_p3 = scmp.lt.s32.totalorder (!%p225_p2), %s666_s23, 63  ;;  %v747_v1 = vld [vmem:[%s1008_s4] ss:$0 sm:$0xff] (!%p225_p2) }
   0x7   : > { %v764_v2 = vld [vmem:[%s1007_s3] ss:$0 sm:$0xff] (!%p225_p2) }
   0x8   : > { %v791_v25 = vld [vmem:[%s1009_s5] ss:$0 sm:$0xff] (!%p225_p2) }
   0xd   : > { %s1012_s23 = smov (!%p260_p3, %s666_s23), 63 }
   0xe   : > { %s737_s24 = sshll.u32 %s1012_s23, 3 }
   0xf   : > { %s753_s7 = scalar_lea.vmem %s1004_s0, %s737_s24  ;;  %s759_s10 = scalar_lea.vmem %s1005_s1, %s737_s24 }
  0x10   : > { %v277_v3 = vld [vmem:[%s753_s7] sm:$0xff]  ;;  %v278_v5 = vld [vmem:[%s753_s7 + $0x8] sm:$0xff]  ;;  %v279_v10 = vld [vmem:[%s753_s7 + $0x10] sm:$0xff]  ;;  %s812_s17 = scalar_lea.vmem %s1010_s6, %s737_s24 }
  0x11   : > { %v387_v4 = vld [vmem:[%s759_s10] sm:$0xff]  ;;  %v316_v6 = vmul.f32 %v742_v0, %v277_v3  ;;  %v317_v8 = vmul.f32 %v742_v0, %v278_v5  ;;  %v388_v9 = vld [vmem:[%s759_s10 + $0x8] sm:$0xff]  ;;  %v389_v11 = vld [vmem:[%s759_s10 + $0x10] sm:$0xff]  ;;  %v318_v13 = vmul.f32 %v742_v0, %v279_v10 }
  0x12   : > { %v426_v7 = vmul.f32 %v747_v1, %v387_v4  ;;  %v427_v12 = vmul.f32 %v747_v1, %v388_v9  ;;  %v428_v14 = vmul.f32 %v747_v1, %v389_v11  ;;  %v280_v15 = vld [vmem:[%s753_s7 + $0x18] sm:$0xff]  ;;  %v281_v17 = vld [vmem:[%s753_s7 + $0x20] sm:$0xff]  ;;  %v282_v23 = vld [vmem:[%s753_s7 + $0x28] sm:$0xff] }
  0x13   : > { %v390_v16 = vld [vmem:[%s759_s10 + $0x18] sm:$0xff]  ;;  %v355_v18 = vadd.f32 %v764_v2, %v316_v6  ;;  %v356_v19 = vadd.f32 %v764_v2, %v317_v8  ;;  %v319_v20 = vmul.f32 %v742_v0, %v280_v15  ;;  %v391_v22 = vld [vmem:[%s759_s10 + $0x20] sm:$0xff]  ;;  %v392_v24 = vld [vmem:[%s759_s10 + $0x28] sm:$0xff]  ;;  %v357_v26 = vadd.f32 %v764_v2, %v318_v13 }
  0x14   : > { %v429_v21 = vmul.f32 %v747_v1, %v390_v16  ;;  %v320_v27 = vmul.f32 %v742_v0, %v281_v17  ;;  %v430_v28 = vmul.f32 %v747_v1, %v391_v22  ;;  %v321_v29 = vmul.f32 %v742_v0, %v282_v23  ;;  %v283_v30 = vld [vmem:[%s753_s7 + $0x30] sm:$0xff]  ;;  %v284_v40 = vld [vmem:[%s753_s7 + $0x38] sm:$0xff]  ;;  %v285_v50 = vld [vmem:[%s753_s7 + $0x40] sm:$0xff] }
  0x15   : > { %v393_v31 = vld [vmem:[%s759_s10 + $0x30] sm:$0xff]  ;;  %v458_v32 = vadd.f32 %v426_v7, %v355_v18  ;;  %v459_v33 = vadd.f32 %v427_v12, %v356_v19  ;;  %v358_v34 = vadd.f32 %v764_v2, %v319_v20  ;;  %v431_v35 = vmul.f32 %v747_v1, %v392_v24  ;;  %v394_v49 = vld [vmem:[%s759_s10 + $0x38] sm:$0xff]  ;;  %v395_v55 = vld [vmem:[%s759_s10 + $0x40] sm:$0xff] }
  0x16   : > { %v460_v36 = vadd.f32 %v428_v14, %v357_v26  ;;  %v359_v37 = vadd.f32 %v764_v2, %v320_v27  ;;  %v360_v38 = vadd.f32 %v764_v2, %v321_v29  ;;  %v322_v39 = vmul.f32 %v742_v0, %v283_v30  ;;  %v286_v60 = vld [vmem:[%s753_s7 + $0x48] sm:$0xff]  ;;  %v287_v5 = vld [vmem:[%s753_s7 + $0x50] sm:$0xff]  ;;  %v288_v7 = vld [vmem:[%s753_s7 + $0x58] sm:$0xff] }
  0x17   : > { %v497_v41 = vadd.f32 %v791_v25, %v458_v32  ;;  %v498_v42 = vadd.f32 %v791_v25, %v459_v33  ;;  %v461_v43 = vadd.f32 %v429_v21, %v358_v34  ;;  %v432_v44 = vmul.f32 %v747_v1, %v393_v31  ;;  %v396_v61 = vld [vmem:[%s759_s10 + $0x48] sm:$0xff]  ;;  %v397_v6 = vld [vmem:[%s759_s10 + $0x50] sm:$0xff]  ;;  %v398_v12 = vld [vmem:[%s759_s10 + $0x58] sm:$0xff] }
  0x18   : > { %v499_v45 = vadd.f32 %v791_v25, %v460_v36  ;;  %v462_v46 = vadd.f32 %v430_v28, %v359_v37  ;;  %v463_v47 = vadd.f32 %v431_v35, %v360_v38  ;;  %v361_v48 = vadd.f32 %v764_v2, %v322_v39  ;;  %v289_v17 = vld [vmem:[%s753_s7 + $0x60] sm:$0xff]  ;;  %v290_v23 = vld [vmem:[%s753_s7 + $0x68] sm:$0xff]  ;;  %v291_v34 = vld [vmem:[%s753_s7 + $0x70] sm:$0xff] }
  0x19   : > { %v529_v51 = vmax.f32 %v497_v41, 0.0  ;;  %v530_v52 = vmax.f32 %v498_v42, 0.0  ;;  %v500_v53 = vadd.f32 %v791_v25, %v461_v43  ;;  %v323_v54 = vmul.f32 %v742_v0, %v284_v40  ;;  %v399_v18 = vld [vmem:[%s759_s10 + $0x60] sm:$0xff]  ;;  %v400_v29 = vld [vmem:[%s759_s10 + $0x68] sm:$0xff]  ;;  %v401_v39 = vld [vmem:[%s759_s10 + $0x70] sm:$0xff] }
  0x1a   : > { %v531_v56 = vmax.f32 %v499_v45, 0.0  ;;  %v501_v57 = vadd.f32 %v791_v25, %v462_v46  ;;  %v502_v58 = vadd.f32 %v791_v25, %v463_v47  ;;  %v464_v59 = vadd.f32 %v432_v44, %v361_v48  ;;  %v292_v44 = vld [vmem:[%s753_s7 + $0x78] sm:$0xff] }
  0x1b   : > { %561 = vst [vmem:[%s812_s17] sm:$0xff] %v529_v51  ;;  %562 = vst [vmem:[%s812_s17 + $0x8] sm:$0xff] %v530_v52  ;;  %v532_v62 = vmax.f32 %v500_v53, 0.0  ;;  %v362_v63 = vadd.f32 %v764_v2, %v323_v54  ;;  %v433_v3 = vmul.f32 %v747_v1, %v394_v49  ;;  %v324_v4 = vmul.f32 %v742_v0, %v285_v50  ;;  %v402_v49 = vld [vmem:[%s759_s10 + $0x78] sm:$0xff]  ;;  %v293_v54 = vld [vmem:[%s753_s7 + $0x80] sm:$0xff] }
  0x1c   : > { %563 = vst [vmem:[%s812_s17 + $0x10] sm:$0xff] %v531_v56  ;;  %v533_v8 = vmax.f32 %v501_v57, 0.0  ;;  %v534_v9 = vmax.f32 %v502_v58, 0.0  ;;  %v503_v10 = vadd.f32 %v791_v25, %v464_v59  ;;  %v434_v11 = vmul.f32 %v747_v1, %v395_v55  ;;  %v403_v59 = vld [vmem:[%s759_s10 + $0x80] sm:$0xff] }
  0x1d   : > { %564 = vst [vmem:[%s812_s17 + $0x18] sm:$0xff] %v532_v62  ;;  %v465_v13 = vadd.f32 %v433_v3, %v362_v63  ;;  %v363_v14 = vadd.f32 %v764_v2, %v324_v4  ;;  %v325_v15 = vmul.f32 %v742_v0, %v286_v60  ;;  %v435_v16 = vmul.f32 %v747_v1, %v396_v61  ;;  %v294_v60 = vld [vmem:[%s753_s7 + $0x88] sm:$0xff] }
  0x1e   : > { %565 = vst [vmem:[%s812_s17 + $0x20] sm:$0xff] %v533_v8  ;;  %566 = vst [vmem:[%s812_s17 + $0x28] sm:$0xff] %v534_v9  ;;  %v535_v19 = vmax.f32 %v503_v10, 0.0  ;;  %v326_v20 = vmul.f32 %v742_v0, %v287_v5  ;;  %v436_v21 = vmul.f32 %v747_v1, %v397_v6  ;;  %v327_v22 = vmul.f32 %v742_v0, %v288_v7  ;;  %v404_v61 = vld [vmem:[%s759_s10 + $0x88] sm:$0xff]  ;;  %v295_v9 = vld [vmem:[%s753_s7 + $0x90] sm:$0xff] }
  0x1f   : > { %v504_v24 = vadd.f32 %v791_v25, %v465_v13  ;;  %v466_v26 = vadd.f32 %v434_v11, %v363_v14  ;;  %v364_v27 = vadd.f32 %v764_v2, %v325_v15  ;;  %v437_v28 = vmul.f32 %v747_v1, %v398_v12  ;;  %v405_v10 = vld [vmem:[%s759_s10 + $0x90] sm:$0xff]  ;;  %v296_v11 = vld [vmem:[%s753_s7 + $0x98] sm:$0xff] }
  0x20   : > { %567 = vst [vmem:[%s812_s17 + $0x30] sm:$0xff] %v535_v19  ;;  %v365_v30 = vadd.f32 %v764_v2, %v326_v20  ;;  %v366_v31 = vadd.f32 %v764_v2, %v327_v22  ;;  %v328_v32 = vmul.f32 %v742_v0, %v289_v17  ;;  %v438_v33 = vmul.f32 %v747_v1, %v399_v18 }
  0x21   : > { %v536_v35 = vmax.f32 %v504_v24, 0.0  ;;  %v505_v36 = vadd.f32 %v791_v25, %v466_v26  ;;  %v467_v37 = vadd.f32 %v435_v16, %v364_v27  ;;  %v329_v38 = vmul.f32 %v742_v0, %v290_v23  ;;  %v406_v16 = vld [vmem:[%s759_s10 + $0x98] sm:$0xff]  ;;  %v407_v27 = vld [vmem:[%s759_s10 + $0xa0] sm:$0xff] }
  0x22   : > { %v468_v40 = vadd.f32 %v436_v21, %v365_v30  ;;  %v469_v41 = vadd.f32 %v437_v28, %v366_v31  ;;  %v367_v42 = vadd.f32 %v764_v2, %v328_v32  ;;  %v439_v43 = vmul.f32 %v747_v1, %v400_v29  ;;  %v297_v21 = vld [vmem:[%s753_s7 + $0xa0] sm:$0xff]  ;;  %v298_v28 = vld [vmem:[%s753_s7 + $0xa8] sm:$0xff] }
  0x23   : > { %568 = vst [vmem:[%s812_s17 + $0x38] sm:$0xff] %v536_v35  ;;  %v537_v45 = vmax.f32 %v505_v36, 0.0  ;;  %v506_v46 = vadd.f32 %v791_v25, %v467_v37  ;;  %v368_v47 = vadd.f32 %v764_v2, %v329_v38  ;;  %v330_v48 = vmul.f32 %v742_v0, %v291_v34  ;;  %v408_v37 = vld [vmem:[%s759_s10 + $0xa8] sm:$0xff]  ;;  %v299_v38 = vld [vmem:[%s753_s7 + $0xb0] sm:$0xff] }
  0x24   : > { %v507_v50 = vadd.f32 %v791_v25, %v468_v40  ;;  %v508_v51 = vadd.f32 %v791_v25, %v469_v41  ;;  %v470_v52 = vadd.f32 %v438_v33, %v367_v42  ;;  %v440_v53 = vmul.f32 %v747_v1, %v401_v39 }
  0x25   : > { %569 = vst [vmem:[%s812_s17 + $0x40] sm:$0xff] %v537_v45  ;;  %v538_v55 = vmax.f32 %v506_v46, 0.0  ;;  %v471_v56 = vadd.f32 %v439_v43, %v368_v47  ;;  %v369_v57 = vadd.f32 %v764_v2, %v330_v48  ;;  %v331_v58 = vmul.f32 %v742_v0, %v292_v44  ;;  %v409_v47 = vld [vmem:[%s759_s10 + $0xb0] sm:$0xff]  ;;  %v300_v48 = vld [vmem:[%s753_s7 + $0xb8] sm:$0xff] }
  0x26   : > { %v539_v62 = vmax.f32 %v507_v50, 0.0  ;;  %v540_v63 = vmax.f32 %v508_v51, 0.0  ;;  %v509_v3 = vadd.f32 %v791_v25, %v470_v52  ;;  %v441_v4 = vmul.f32 %v747_v1, %v402_v49 }
  0x27   : > { %570 = vst [vmem:[%s812_s17 + $0x48] sm:$0xff] %v538_v55  ;;  %v510_v5 = vadd.f32 %v791_v25, %v471_v56  ;;  %v472_v6 = vadd.f32 %v440_v53, %v369_v57  ;;  %v370_v7 = vadd.f32 %v764_v2, %v331_v58  ;;  %v332_v8 = vmul.f32 %v742_v0, %v293_v54  ;;  %v410_v53 = vld [vmem:[%s759_s10 + $0xb8] sm:$0xff]  ;;  %v301_v58 = vld [vmem:[%s753_s7 + $0xc0] sm:$0xff] }
  0x28   : > { %571 = vst [vmem:[%s812_s17 + $0x50] sm:$0xff] %v539_v62  ;;  %572 = vst [vmem:[%s812_s17 + $0x58] sm:$0xff] %v540_v63  ;;  %v541_v12 = vmax.f32 %v509_v3, 0.0  ;;  %v442_v13 = vmul.f32 %v747_v1, %v403_v59  ;;  %v333_v14 = vmul.f32 %v742_v0, %v294_v60  ;;  %v443_v15 = vmul.f32 %v747_v1, %v404_v61  ;;  %v411_v63 = vld [vmem:[%s759_s10 + $0xc0] sm:$0xff]  ;;  %v302_v3 = vld [vmem:[%s753_s7 + $0xc8] sm:$0xff] }
  0x29   : > { %v542_v17 = vmax.f32 %v510_v5, 0.0  ;;  %v511_v18 = vadd.f32 %v791_v25, %v472_v6  ;;  %v473_v19 = vadd.f32 %v441_v4, %v370_v7  ;;  %v371_v20 = vadd.f32 %v764_v2, %v332_v8  ;;  %v412_v4 = vld [vmem:[%s759_s10 + $0xc8] sm:$0xff] }
  0x2a   : > { %573 = vst [vmem:[%s812_s17 + $0x60] sm:$0xff] %v541_v12  ;;  %v372_v22 = vadd.f32 %v764_v2, %v333_v14  ;;  %v334_v23 = vmul.f32 %v742_v0, %v295_v9  ;;  %v444_v24 = vmul.f32 %v747_v1, %v405_v10  ;;  %v335_v26 = vmul.f32 %v742_v0, %v296_v11  ;;  %v413_v14 = vld [vmem:[%s759_s10 + $0xd0] sm:$0xff] }
  0x2b   : > { %574 = vst [vmem:[%s812_s17 + $0x68] sm:$0xff] %v542_v17  ;;  %v543_v29 = vmax.f32 %v511_v18, 0.0  ;;  %v512_v30 = vadd.f32 %v791_v25, %v473_v19  ;;  %v474_v31 = vadd.f32 %v442_v13, %v371_v20  ;;  %v445_v32 = vmul.f32 %v747_v1, %v406_v16  ;;  %v303_v13 = vld [vmem:[%s753_s7 + $0xd0] sm:$0xff]  ;;  %v414_v20 = vld [vmem:[%s759_s10 + $0xd8] sm:$0xff] }
  0x2c   : > { %v475_v33 = vadd.f32 %v443_v15, %v372_v22  ;;  %v373_v34 = vadd.f32 %v764_v2, %v334_v23  ;;  %v374_v35 = vadd.f32 %v764_v2, %v335_v26  ;;  %v336_v36 = vmul.f32 %v742_v0, %v297_v21  ;;  %v304_v15 = vld [vmem:[%s753_s7 + $0xd8] sm:$0xff]  ;;  %v305_v26 = vld [vmem:[%s753_s7 + $0xe0] sm:$0xff] }
  0x2d   : > { %575 = vst [vmem:[%s812_s17 + $0x70] sm:$0xff] %v543_v29  ;;  %v544_v39 = vmax.f32 %v512_v30, 0.0  ;;  %v513_v40 = vadd.f32 %v791_v25, %v474_v31  ;;  %v446_v41 = vmul.f32 %v747_v1, %v407_v27  ;;  %v337_v42 = vmul.f32 %v742_v0, %v298_v28  ;;  %v415_v31 = vld [vmem:[%s759_s10 + $0xe0] sm:$0xff] }
  0x2e   : > { %v514_v43 = vadd.f32 %v791_v25, %v475_v33  ;;  %v476_v44 = vadd.f32 %v444_v24, %v373_v34  ;;  %v477_v45 = vadd.f32 %v445_v32, %v374_v35  ;;  %v375_v46 = vadd.f32 %v764_v2, %v336_v36  ;;  %v306_v32 = vld [vmem:[%s753_s7 + $0xe8] sm:$0xff] }
  0x2f   : > { %576 = vst [vmem:[%s812_s17 + $0x78] sm:$0xff] %v544_v39  ;;  %v545_v49 = vmax.f32 %v513_v40, 0.0  ;;  %v376_v50 = vadd.f32 %v764_v2, %v337_v42  ;;  %v447_v51 = vmul.f32 %v747_v1, %v408_v37  ;;  %v338_v52 = vmul.f32 %v742_v0, %v299_v38  ;;  %v307_v42 = vld [vmem:[%s753_s7 + $0xf0] sm:$0xff] }
  0x30   : > { %v546_v54 = vmax.f32 %v514_v43, 0.0  ;;  %v515_v55 = vadd.f32 %v791_v25, %v476_v44  ;;  %v516_v56 = vadd.f32 %v791_v25, %v477_v45  ;;  %v478_v57 = vadd.f32 %v446_v41, %v375_v46  ;;  %v416_v41 = vld [vmem:[%s759_s10 + $0xe8] sm:$0xff] }
  0x31   : > { %577 = vst [vmem:[%s812_s17 + $0x80] sm:$0xff] %v545_v49  ;;  %v479_v59 = vadd.f32 %v447_v51, %v376_v50  ;;  %v377_v60 = vadd.f32 %v764_v2, %v338_v52  ;;  %v448_v61 = vmul.f32 %v747_v1, %v409_v47  ;;  %v339_v62 = vmul.f32 %v742_v0, %v300_v48  ;;  %v417_v51 = vld [vmem:[%s759_s10 + $0xf0] sm:$0xff]  ;;  %v308_v52 = vld [vmem:[%s753_s7 + $0xf8] sm:$0xff] }
  0x32   : > { %578 = vst [vmem:[%s812_s17 + $0x88] sm:$0xff] %v546_v54  ;;  %v547_v5 = vmax.f32 %v515_v55, 0.0  ;;  %v548_v6 = vmax.f32 %v516_v56, 0.0  ;;  %v517_v7 = vadd.f32 %v791_v25, %v478_v57  ;;  %v449_v8 = vmul.f32 %v747_v1, %v410_v53  ;;  %v418_v57 = vld [vmem:[%s759_s10 + $0xf8] sm:$0xff] }
  0x33   : > { %v518_v9 = vadd.f32 %v791_v25, %v479_v59  ;;  %v480_v10 = vadd.f32 %v448_v61, %v377_v60  ;;  %v378_v11 = vadd.f32 %v764_v2, %v339_v62  ;;  %v340_v12 = vmul.f32 %v742_v0, %v301_v58 }
  0x34   : > { %579 = vst [vmem:[%s812_s17 + $0x90] sm:$0xff] %v547_v5  ;;  %580 = vst [vmem:[%s812_s17 + $0x98] sm:$0xff] %v548_v6  ;;  %v549_v16 = vmax.f32 %v517_v7, 0.0  ;;  %v450_v17 = vmul.f32 %v747_v1, %v411_v63  ;;  %v341_v18 = vmul.f32 %v742_v0, %v302_v3  ;;  %v451_v19 = vmul.f32 %v747_v1, %v412_v4 }
  0x35   : > { %v550_v21 = vmax.f32 %v518_v9, 0.0  ;;  %v519_v22 = vadd.f32 %v791_v25, %v480_v10  ;;  %v481_v23 = vadd.f32 %v449_v8, %v378_v11  ;;  %v379_v24 = vadd.f32 %v764_v2, %v340_v12 }
  0x36   : > { %581 = vst [vmem:[%s812_s17 + $0xa0] sm:$0xff] %v549_v16  ;;  %v380_v27 = vadd.f32 %v764_v2, %v341_v18  ;;  %v342_v28 = vmul.f32 %v742_v0, %v303_v13  ;;  %v452_v29 = vmul.f32 %v747_v1, %v413_v14  ;;  %v343_v30 = vmul.f32 %v742_v0, %v304_v15 }
  0x37   : > { %582 = vst [vmem:[%s812_s17 + $0xa8] sm:$0xff] %v550_v21  ;;  %v551_v33 = vmax.f32 %v519_v22, 0.0  ;;  %v520_v34 = vadd.f32 %v791_v25, %v481_v23  ;;  %v482_v35 = vadd.f32 %v450_v17, %v379_v24  ;;  %v453_v36 = vmul.f32 %v747_v1, %v414_v20 }
  0x38   : > { %v483_v37 = vadd.f32 %v451_v19, %v380_v27  ;;  %v381_v38 = vadd.f32 %v764_v2, %v342_v28  ;;  %v382_v39 = vadd.f32 %v764_v2, %v343_v30  ;;  %v344_v40 = vmul.f32 %v742_v0, %v305_v26 }
  0x39   : > { %583 = vst [vmem:[%s812_s17 + $0xb0] sm:$0xff] %v551_v33  ;;  %v552_v43 = vmax.f32 %v520_v34, 0.0  ;;  %v521_v44 = vadd.f32 %v791_v25, %v482_v35  ;;  %v454_v45 = vmul.f32 %v747_v1, %v415_v31  ;;  %v345_v46 = vmul.f32 %v742_v0, %v306_v32 }
  0x3a   : > { %v522_v47 = vadd.f32 %v791_v25, %v483_v37  ;;  %v484_v48 = vadd.f32 %v452_v29, %v381_v38  ;;  %v485_v49 = vadd.f32 %v453_v36, %v382_v39  ;;  %v383_v50 = vadd.f32 %v764_v2, %v344_v40 }
  0x3b   : > { %584 = vst [vmem:[%s812_s17 + $0xb8] sm:$0xff] %v552_v43  ;;  %v553_v53 = vmax.f32 %v521_v44, 0.0  ;;  %v384_v54 = vadd.f32 %v764_v2, %v345_v46  ;;  %v455_v55 = vmul.f32 %v747_v1, %v416_v41  ;;  %v346_v56 = vmul.f32 %v742_v0, %v307_v42 }
  0x3c   : > { %v554_v58 = vmax.f32 %v522_v47, 0.0  ;;  %v523_v59 = vadd.f32 %v791_v25, %v484_v48  ;;  %v524_v60 = vadd.f32 %v791_v25, %v485_v49  ;;  %v486_v61 = vadd.f32 %v454_v45, %v383_v50 }
  0x3d   : > { %585 = vst [vmem:[%s812_s17 + $0xc0] sm:$0xff] %v553_v53  ;;  %v487_v62 = vadd.f32 %v455_v55, %v384_v54  ;;  %v385_v63 = vadd.f32 %v764_v2, %v346_v56  ;;  %v456_v3 = vmul.f32 %v747_v1, %v417_v51  ;;  %v347_v4 = vmul.f32 %v742_v0, %v308_v52 }
  0x3e   : > { %586 = vst [vmem:[%s812_s17 + $0xc8] sm:$0xff] %v554_v58  ;;  %v555_v5 = vmax.f32 %v523_v59, 0.0  ;;  %v556_v6 = vmax.f32 %v524_v60, 0.0  ;;  %v525_v7 = vadd.f32 %v791_v25, %v486_v61  ;;  %v457_v8 = vmul.f32 %v747_v1, %v418_v57 }
  0x3f   : > { %v526_v9 = vadd.f32 %v791_v25, %v487_v62  ;;  %v488_v10 = vadd.f32 %v456_v3, %v385_v63  ;;  %v386_v11 = vadd.f32 %v764_v2, %v347_v4 }
  0x40   : > { %587 = vst [vmem:[%s812_s17 + $0xd0] sm:$0xff] %v555_v5  ;;  %588 = vst [vmem:[%s812_s17 + $0xd8] sm:$0xff] %v556_v6  ;;  %v557_v12 = vmax.f32 %v525_v7, 0.0 }
  0x41   : > { %v558_v13 = vmax.f32 %v526_v9, 0.0  ;;  %v527_v0 = vadd.f32 %v791_v25, %v488_v10  ;;  %v489_v14 = vadd.f32 %v457_v8, %v386_v11 }
  0x42   : > { %589 = vst [vmem:[%s812_s17 + $0xe0] sm:$0xff] %v557_v12 }
  0x43   : > { %590 = vst [vmem:[%s812_s17 + $0xe8] sm:$0xff] %v558_v13  ;;  %v559_v15 = vmax.f32 %v527_v0, 0.0  ;;  %v528_v16 = vadd.f32 %v791_v25, %v489_v14 }
  0x45   : > { %591 = vst [vmem:[%s812_s17 + $0xf0] sm:$0xff] %v559_v15  ;;  %v560_v1 = vmax.f32 %v528_v16, 0.0 }
  0x47   : > { %592 = vst [vmem:[%s812_s17 + $0xf8] sm:$0xff] %v560_v1 }
  0x48 PF: > { %s16_s21 = sadd.s32 1, %s692_s21  }
  0x49   : > { %p13_p4 = scmp.ge.s32.totalorder %s16_s21, 4  }
  0x4b   :  { %15 = sbr.rel (!%p13_p4) target bundleno = 1 (0x1), region = 77 }

</bundles_post_ra>
